<compile_context>
chip_gen: v5e
topology: v5e:2x2
jax: 0.10.0
libtpu: 0.0.40
codegen_flags: <defaults>
</compile_context>

<pallas_src>
import jax
import jax.numpy as jnp
import numpy as np
from jax.experimental import pallas as pl
from jax.experimental.pallas import tpu as pltpu


# ----------------------------------------------------------------------------
# Fused Pallas kernel (built per static shape)
# ----------------------------------------------------------------------------
def _make_fused_kernel(T, B_blk, num_layers, H):
    unroll_time = T <= 16  # short static trip-count: full unroll; else fori_loop

    def kernel(x_ref, *refs):
        lstm_refs = refs[: 3 * num_layers]
        tail = refs[3 * num_layers:]
        if num_layers > 1:
            w1_ref, b1_ref, w2_ref, b2_ref, out_ref, gx_scr, seq_scr = tail
        else:
            w1_ref, b1_ref, w2_ref, b2_ref, out_ref, gx_scr = tail
            seq_scr = None

        h = None
        for layer in range(num_layers):
            wih = lstm_refs[3 * layer][...]      # (I_l, 4H) = W_ih^T (gate-reordered)
            whh = lstm_refs[3 * layer + 1][...]  # (H,  4H) = W_hh^T (gate-reordered)
            b = lstm_refs[3 * layer + 2][...]    # (1,  4H) = b_ih + b_hh (f32)
            mdt = wih.dtype                      # matmul operand dtype (f32 or bf16)
            last_layer = layer + 1 == num_layers

            # Hoisted, time-parallel input projection for the whole layer:
            # one (T*B_blk, I) @ (I, 4H) MXU matmul, staged into VMEM scratch.
            cur = x_ref[...] if layer == 0 else seq_scr[...]
            gx_scr[...] = (jnp.dot(cur.astype(mdt), wih,
                                   preferred_element_type=jnp.float32) + b)

            h = jnp.zeros((B_blk, H), jnp.float32)
            c = jnp.zeros((B_blk, H), jnp.float32)

            def step(t, h, c):
                start = t * B_blk
                if not isinstance(start, int):
                    start = pl.multiple_of(start, B_blk)
                row = pl.ds(start, B_blk)
                # Serial critical path: only h @ W_hh^T + f32 gate math.
                g = gx_scr[row, :] + jnp.dot(h.astype(mdt), whh,
                                             preferred_element_type=jnp.float32)
                sig = jax.nn.sigmoid(g[:, :3 * H])   # i, f, o  (one contiguous slice)
                g_g = jnp.tanh(g[:, 3 * H:])         # g
                c = sig[:, H:2 * H] * c + sig[:, :H] * g_g
                h = sig[:, 2 * H:3 * H] * jnp.tanh(c)
                if not last_layer:
                    seq_scr[row, :] = h              # VMEM only, sublane-aligned store
                return h, c

            if unroll_time:
                for t in range(T):
                    h, c = step(t, h, c)
            else:
                h, c = jax.lax.fori_loop(0, T, lambda t, hc: step(t, *hc),
                                         (h, c), unroll=2)

        # Head on the LAST timestep only: fc1 -> ReLU -> dropout(eval) -> fc2 -> sigmoid
        z = jnp.dot(h, w1_ref[...], preferred_element_type=jnp.float32) + b1_ref[...]
        z = jnp.maximum(z, 0.0)
        # TODO(synk): nn.Dropout(0.2) is identity in eval mode; training-mode masking not implemented.
        y = jnp.dot(z, w2_ref[...], preferred_element_type=jnp.float32) + b2_ref[...]
        out_ref[...] = jax.nn.sigmoid(y).astype(out_ref.dtype)

    return kernel


# ----------------------------------------------------------------------------
# Parameter prep (one-time, outside jit)
# ----------------------------------------------------------------------------
def _reorder_ifgo_to_ifog(w):
    """Permute last-axis gate blocks from PyTorch (i,f,g,o) to (i,f,o,g)."""
    H = w.shape[-1] // 4
    return jnp.concatenate([w[..., :2 * H], w[..., 3 * H:], w[..., 2 * H:3 * H]],
                           axis=-1)


def prepare_params(params, matmul_dtype=jnp.float32):
    """Pre-transpose weights, fuse LSTM biases, reorder gates, optionally cast the
    matmul operands to bf16 (accumulation & gate math stay f32 in the kernel)."""
    lstm = []
    for (w_ih, w_hh, b_ih, b_hh) in params["lstm"]:
        wih_t = _reorder_ifgo_to_ifog(jnp.transpose(w_ih)).astype(matmul_dtype)  # (I, 4H)
        whh_t = _reorder_ifgo_to_ifog(jnp.transpose(w_hh)).astype(matmul_dtype)  # (H, 4H)
        bias = _reorder_ifgo_to_ifog(b_ih + b_hh)[None, :].astype(jnp.float32)   # (1, 4H)
        lstm.append((wih_t, whh_t, bias))
    w1, b1 = params["fc1"]
    w2, b2 = params["fc2"]
    return {
        "lstm": tuple(lstm),
        "fc1": (jnp.transpose(w1), b1[None, :]),   # (H, 32), (1, 32)
        "fc2": (jnp.transpose(w2), b2[None, :]),   # (32, O), (1, O)
    }


# ----------------------------------------------------------------------------
# Wrapper
# ----------------------------------------------------------------------------
@jax.jit
def lstm_model_forward(x, prepped):
    """x: (B, T, input_size) batch_first, like the PyTorch module."""
    B, T, I = x.shape
    lstm_w = prepped["lstm"]
    num_layers = len(lstm_w)
    H = lstm_w[0][1].shape[0]
    w1_t, b1 = prepped["fc1"]
    w2_t, b2 = prepped["fc2"]
    O = w2_t.shape[1]

    # Batch padding / blocking: sublane-aligned blocks; grid splits batch blocks
    # across cores (useful on v7x's 2 TCs once B is large).
    if B <= 128:
        B_blk = -(-B // 8) * 8
        B_pad = B_blk
    else:
        B_blk = 128
        B_pad = -(-B // 128) * 128
    n_blocks = B_pad // B_blk

    xp = x if B_pad == B else jnp.pad(x, ((0, B_pad - B), (0, 0), (0, 0)))
    # (B_pad, T, I) -> (n_blocks, T*B_blk, I): time-major within each batch block so
    # the layer-0 input projection is one plain 2-D matmul, no in-kernel reshapes.
    x_arr = xp.reshape(n_blocks, B_blk, T, I).transpose(0, 2, 1, 3).reshape(
        n_blocks, T * B_blk, I)

    args = [x_arr]
    in_specs = [pl.BlockSpec((None, T * B_blk, I), lambda i: (i, 0, 0))]
    for (wih_t, whh_t, bias) in lstm_w:
        args += [wih_t, whh_t, bias]
        in_specs += [
            pl.BlockSpec(wih_t.shape, lambda i: (0, 0)),
            pl.BlockSpec(whh_t.shape, lambda i: (0, 0)),
            pl.BlockSpec(bias.shape, lambda i: (0, 0)),
        ]
    args += [w1_t, b1, w2_t, b2]
    in_specs += [
        pl.BlockSpec(w1_t.shape, lambda i: (0, 0)),
        pl.BlockSpec(b1.shape, lambda i: (0, 0)),
        pl.BlockSpec(w2_t.shape, lambda i: (0, 0)),
        pl.BlockSpec(b2.shape, lambda i: (0, 0)),
    ]

    scratch_shapes = [pltpu.VMEM((T * B_blk, 4 * H), jnp.float32)]   # staged gx
    if num_layers > 1:
        scratch_shapes.append(pltpu.VMEM((T * B_blk, H), jnp.float32))  # hidden seq

    # Explicit VMEM budget + cost estimate.
    def nbytes(a):
        return int(a.size) * a.dtype.itemsize

    weight_bytes = sum(nbytes(w) for lw in lstm_w for w in lw)
    weight_bytes += nbytes(w1_t) + nbytes(b1) + nbytes(w2_t) + nbytes(b2)
    x_blk_bytes = T * B_blk * I * x.dtype.itemsize
    out_blk_bytes = B_blk * O * x.dtype.itemsize
    scratch_bytes = T * B_blk * 4 * H * 4 + (T * B_blk * H * 4 if num_layers > 1 else 0)
    needed = 2 * (x_blk_bytes + weight_bytes + out_blk_bytes) + scratch_bytes
    vmem_limit = int(min(max(2 * needed, 16 * 2**20), 100 * 2**20))

    flops = 0
    in_sz = I
    for _ in range(num_layers):
        flops += 2 * T * B_pad * (in_sz + H) * 4 * H
        in_sz = H
    flops += 2 * B_pad * (H * 32 + 32 * O)
    cost = pl.CostEstimate(
        flops=int(flops),
        transcendentals=int(T * num_layers * B_pad * 5 * H + B_pad * O),
        bytes_accessed=int(nbytes(x) + weight_bytes + B_pad * O * x.dtype.itemsize),
    )

    kernel = _make_fused_kernel(T, B_blk, num_layers, H)
    out = pl.pallas_call(
        kernel,
        out_shape=jax.ShapeDtypeStruct((B_pad, O), x.dtype),
        grid_spec=pltpu.PrefetchScalarGridSpec(
            num_scalar_prefetch=0,
            grid=(n_blocks,),
            in_specs=in_specs,
            out_specs=pl.BlockSpec((B_blk, O), lambda i: (i, 0)),
            scratch_shapes=scratch_shapes,
        ),
        compiler_params=pltpu.CompilerParams(
            dimension_semantics=("parallel",),
            vmem_limit_bytes=vmem_limit),
        cost_estimate=cost,
    )(*args)
    return out[:B]


# ----------------------------------------------------------------------------
# Pure-JAX reference (for correctness check)
# ----------------------------------------------------------------------------
def lstm_model_ref(x, params):
    seq = x  # (B, T, I)
    for (w_ih, w_hh, b_ih, b_hh) in params["lstm"]:
        H = w_hh.shape[1]
        B, T, _ = seq.shape
        h = jnp.zeros((B, H), jnp.float32)
        c = jnp.zeros((B, H), jnp.float32)
        outs = []
        for t in range(T):
            g = seq[:, t] @ w_ih.T + h @ w_hh.T + b_ih + b_hh
            i_g = jax.nn.sigmoid(g[:, 0 * H:1 * H])
            f_g = jax.nn.sigmoid(g[:, 1 * H:2 * H])
            g_g = jnp.tanh(g[:, 2 * H:3 * H])
            o_g = jax.nn.sigmoid(g[:, 3 * H:4 * H])
            c = f_g * c + i_g * g_g
            h = o_g * jnp.tanh(c)
            outs.append(h)
        seq = jnp.stack(outs, axis=1)
    last = seq[:, -1, :]
    w1, b1 = params["fc1"]
    w2, b2 = params["fc2"]
    h1 = jnp.maximum(last @ w1.T + b1, 0.0)
    return jax.nn.sigmoid(h1 @ w2.T + b2)


# ----------------------------------------------------------------------------
# Deterministic parameter init (PyTorch-style U(-1/sqrt(H), 1/sqrt(H)))
# ----------------------------------------------------------------------------
def init_params(key, input_size, hidden_size, num_layers, output_size):
    params = {"lstm": []}
    bound = 1.0 / np.sqrt(hidden_size)
    for layer in range(num_layers):
        in_sz = input_size if layer == 0 else hidden_size
        key, k1, k2, k3, k4 = jax.random.split(key, 5)
        w_ih = jax.random.uniform(k1, (4 * hidden_size, in_sz), jnp.float32, -bound, bound)
        w_hh = jax.random.uniform(k2, (4 * hidden_size, hidden_size), jnp.float32, -bound, bound)
        b_ih = jax.random.uniform(k3, (4 * hidden_size,), jnp.float32, -bound, bound)
        b_hh = jax.random.uniform(k4, (4 * hidden_size,), jnp.float32, -bound, bound)
        params["lstm"].append((w_ih, w_hh, b_ih, b_hh))

    key, k1, k2, k3, k4 = jax.random.split(key, 5)
    b1v = 1.0 / np.sqrt(hidden_size)
    params["fc1"] = (
        jax.random.uniform(k1, (32, hidden_size), jnp.float32, -b1v, b1v),
        jax.random.uniform(k2, (32,), jnp.float32, -b1v, b1v),
    )
    b2v = 1.0 / np.sqrt(32)
    params["fc2"] = (
        jax.random.uniform(k3, (output_size, 32), jnp.float32, -b2v, b2v),
        jax.random.uniform(k4, (output_size,), jnp.float32, -b2v, b2v),
    )
    return params


# ----------------------------------------------------------------------------
if __name__ == "__main__":
    B, T = 2, 8
    input_size, hidden_size, num_layers, output_size = 16, 32, 2, 4

    key = jax.random.PRNGKey(0)
    key, kx, kp = jax.random.split(key, 3)
    x = jax.random.normal(kx, (B, T, input_size), jnp.float32)
    params = init_params(kp, input_size, hidden_size, num_layers, output_size)

    ref = lstm_model_ref(x, params)

    # f32 matmul operands (default / v5e): bit-tight vs. reference.
    out_f32 = jax.block_until_ready(
        lstm_model_forward(x, prepare_params(params, jnp.float32)))
    np.testing.assert_allclose(np.asarray(out_f32), np.asarray(ref), rtol=1e-4, atol=1e-5)
    assert out_f32.shape == (B, output_size)

    # bf16 matmul operands (MXU-native on v6e/v7x), f32 accumulation & gate math.
    out_bf16 = jax.block_until_ready(
        lstm_model_forward(x, prepare_params(params, jnp.bfloat16)))
    np.testing.assert_allclose(np.asarray(out_bf16), np.asarray(ref), rtol=5e-2, atol=2e-2)

    print("KERNEL_OK")
</pallas_src>

<mosaic_0001>
module attributes {stable_mosaic.version = 11 : i64} {
  func.func @kernel(%arg0: i32, %arg1: memref<1x64x16xf32, #tpu.memory_space<vmem>>, %arg2: memref<16x128xf32, #tpu.memory_space<vmem>>, %arg3: memref<32x128xf32, #tpu.memory_space<vmem>>, %arg4: memref<1x128xf32, #tpu.memory_space<vmem>>, %arg5: memref<32x128xf32, #tpu.memory_space<vmem>>, %arg6: memref<32x128xf32, #tpu.memory_space<vmem>>, %arg7: memref<1x128xf32, #tpu.memory_space<vmem>>, %arg8: memref<32x32xf32, #tpu.memory_space<vmem>>, %arg9: memref<1x32xf32, #tpu.memory_space<vmem>>, %arg10: memref<32x4xf32, #tpu.memory_space<vmem>>, %arg11: memref<1x4xf32, #tpu.memory_space<vmem>>, %arg12: memref<8x4xf32, #tpu.memory_space<vmem>>, %arg13: memref<64x128xf32, #tpu.memory_space<vmem>>, %arg14: memref<64x32xf32, #tpu.memory_space<vmem>>) attributes {dimension_semantics = [#tpu.dimension_semantics<parallel>], iteration_bounds = array<i64: 1>, scalar_prefetch = 0 : i64, scratch_operands = 2 : i64, tpu.core_type = #tpu.core_type<tc>, window_params = [{transform_indices = @transform_0, window_bounds = array<i64: 1, 64, 16>}, {pipeline_mode = #tpu.pipeline_mode<synchronous>, transform_indices = @transform_1, window_bounds = array<i64: 16, 128>}, {pipeline_mode = #tpu.pipeline_mode<synchronous>, transform_indices = @transform_2, window_bounds = array<i64: 32, 128>}, {pipeline_mode = #tpu.pipeline_mode<synchronous>, transform_indices = @transform_3, window_bounds = array<i64: 1, 128>}, {pipeline_mode = #tpu.pipeline_mode<synchronous>, transform_indices = @transform_4, window_bounds = array<i64: 32, 128>}, {pipeline_mode = #tpu.pipeline_mode<synchronous>, transform_indices = @transform_5, window_bounds = array<i64: 32, 128>}, {pipeline_mode = #tpu.pipeline_mode<synchronous>, transform_indices = @transform_6, window_bounds = array<i64: 1, 128>}, {pipeline_mode = #tpu.pipeline_mode<synchronous>, transform_indices = @transform_7, window_bounds = array<i64: 32, 32>}, {pipeline_mode = #tpu.pipeline_mode<synchronous>, transform_indices = @transform_8, window_bounds = array<i64: 1, 32>}, {pipeline_mode = #tpu.pipeline_mode<synchronous>, transform_indices = @transform_9, window_bounds = array<i64: 32, 4>}, {pipeline_mode = #tpu.pipeline_mode<synchronous>, transform_indices = @transform_10, window_bounds = array<i64: 1, 4>}, {transform_indices = @transform_11, window_bounds = array<i64: 8, 4>}]} {
    %c0 = arith.constant 0 : index
    %c0_0 = arith.constant 0 : index
    %0 = vector.load %arg2[%c0, %c0_0] : memref<16x128xf32, #tpu.memory_space<vmem>>, vector<16x128xf32>
    %c0_1 = arith.constant 0 : index
    %c0_2 = arith.constant 0 : index
    %1 = vector.load %arg3[%c0_1, %c0_2] : memref<32x128xf32, #tpu.memory_space<vmem>>, vector<32x128xf32>
    %c0_3 = arith.constant 0 : index
    %c0_4 = arith.constant 0 : index
    %2 = vector.load %arg4[%c0_3, %c0_4] : memref<1x128xf32, #tpu.memory_space<vmem>>, vector<1x128xf32>
    %c0_5 = arith.constant 0 : index
    %c0_6 = arith.constant 0 : index
    %c0_7 = arith.constant 0 : index
    %3 = vector.load %arg1[%c0_5, %c0_6, %c0_7] : memref<1x64x16xf32, #tpu.memory_space<vmem>>, vector<1x64x16xf32>
    %4 = vector.shape_cast %3 : vector<1x64x16xf32> to vector<64x16xf32>
    %cst = arith.constant dense<0.000000e+00> : vector<64x128xf32>
    %5 = tpu.matmul %4, %0, %cst {dimension_numbers = #tpu.dot_dimension_numbers<[1], [0], [0], [1], [0, 0, 1, 1], [], []>} : vector<64x16xf32>, vector<16x128xf32>, vector<64x128xf32> -> vector<64x128xf32>
    %6 = vector.broadcast %2 : vector<1x128xf32> to vector<64x128xf32>
    %7 = arith.addf %5, %6 : vector<64x128xf32>
    %c0_8 = arith.constant 0 : index
    %c0_9 = arith.constant 0 : index
    %8 = vector.load %arg13[%c0_8, %c0_9] : memref<64x128xf32, #tpu.memory_space<vmem>>, vector<64x128xf32>
    tpu.vector_store %arg13[%c0_8, %c0_9], %7 {strides = array<i32>} : memref<64x128xf32, #tpu.memory_space<vmem>>, vector<64x128xf32>,
    %cst_10 = arith.constant 0.000000e+00 : f32
    %9 = vector.broadcast %cst_10 : f32 to vector<8x32xf32>
    %cst_11 = arith.constant 0.000000e+00 : f32
    %10 = vector.broadcast %cst_11 : f32 to vector<8x32xf32>
    %c0_12 = arith.constant 0 : index
    %c0_13 = arith.constant 0 : index
    %11 = vector.load %arg13[%c0_12, %c0_13] : memref<64x128xf32, #tpu.memory_space<vmem>>, vector<8x128xf32>
    %cst_14 = arith.constant dense<0.000000e+00> : vector<8x128xf32>
    %12 = tpu.matmul %9, %1, %cst_14 {dimension_numbers = #tpu.dot_dimension_numbers<[1], [0], [0], [1], [0, 0, 1, 1], [], []>} : vector<8x32xf32>, vector<32x128xf32>, vector<8x128xf32> -> vector<8x128xf32>
    %13 = arith.addf %11, %12 : vector<8x128xf32>
    %14 = vector.extract_strided_slice %13 {offsets = [0, 0], sizes = [8, 96], strides = [1, 1]} : vector<8x128xf32> to vector<8x96xf32>
    %15 = arith.negf %14 : vector<8x96xf32>
    %16 = math.exp %15 : vector<8x96xf32>
    %cst_15 = arith.constant 1.000000e+00 : f32
    %17 = vector.broadcast %cst_15 : f32 to vector<8x96xf32>
    %18 = arith.addf %17, %16 : vector<8x96xf32>
    %19 = arith.divf %17, %18 : vector<8x96xf32>
    %20 = vector.extract_strided_slice %13 {offsets = [0, 96], sizes = [8, 32], strides = [1, 1]} : vector<8x128xf32> to vector<8x32xf32>
    %21 = math.tanh %20 : vector<8x32xf32>
    %22 = vector.extract_strided_slice %19 {offsets = [0, 32], sizes = [8, 32], strides = [1, 1]} : vector<8x96xf32> to vector<8x32xf32>
    %23 = arith.mulf %22, %10 : vector<8x32xf32>
    %24 = vector.extract_strided_slice %19 {offsets = [0, 0], sizes = [8, 32], strides = [1, 1]} : vector<8x96xf32> to vector<8x32xf32>
    %25 = arith.mulf %24, %21 : vector<8x32xf32>
    %26 = arith.addf %23, %25 : vector<8x32xf32>
    %27 = vector.extract_strided_slice %19 {offsets = [0, 64], sizes = [8, 32], strides = [1, 1]} : vector<8x96xf32> to vector<8x32xf32>
    %28 = math.tanh %26 : vector<8x32xf32>
    %29 = arith.mulf %27, %28 : vector<8x32xf32>
    %c0_16 = arith.constant 0 : index
    %c0_17 = arith.constant 0 : index
    %30 = vector.load %arg14[%c0_16, %c0_17] : memref<64x32xf32, #tpu.memory_space<vmem>>, vector<8x32xf32>
    tpu.vector_store %arg14[%c0_16, %c0_17], %29 {strides = array<i32>} : memref<64x32xf32, #tpu.memory_space<vmem>>, vector<8x32xf32>,
    %c8 = arith.constant 8 : index
    %c0_18 = arith.constant 0 : index
    %31 = vector.load %arg13[%c8, %c0_18] : memref<64x128xf32, #tpu.memory_space<vmem>>, vector<8x128xf32>
    %cst_19 = arith.constant dense<0.000000e+00> : vector<8x128xf32>
    %32 = tpu.matmul %29, %1, %cst_19 {dimension_numbers = #tpu.dot_dimension_numbers<[1], [0], [0], [1], [0, 0, 1, 1], [], []>} : vector<8x32xf32>, vector<32x128xf32>, vector<8x128xf32> -> vector<8x128xf32>
    %33 = arith.addf %31, %32 : vector<8x128xf32>
    %34 = vector.extract_strided_slice %33 {offsets = [0, 0], sizes = [8, 96], strides = [1, 1]} : vector<8x128xf32> to vector<8x96xf32>
    %35 = arith.negf %34 : vector<8x96xf32>
    %36 = math.exp %35 : vector<8x96xf32>
    %cst_20 = arith.constant 1.000000e+00 : f32
    %37 = vector.broadcast %cst_20 : f32 to vector<8x96xf32>
    %38 = arith.addf %37, %36 : vector<8x96xf32>
    %39 = arith.divf %37, %38 : vector<8x96xf32>
    %40 = vector.extract_strided_slice %33 {offsets = [0, 96], sizes = [8, 32], strides = [1, 1]} : vector<8x128xf32> to vector<8x32xf32>
    %41 = math.tanh %40 : vector<8x32xf32>
    %42 = vector.extract_strided_slice %39 {offsets = [0, 32], sizes = [8, 32], strides = [1, 1]} : vector<8x96xf32> to vector<8x32xf32>
    %43 = arith.mulf %42, %26 : vector<8x32xf32>
    %44 = vector.extract_strided_slice %39 {offsets = [0, 0], sizes = [8, 32], strides = [1, 1]} : vector<8x96xf32> to vector<8x32xf32>
    %45 = arith.mulf %44, %41 : vector<8x32xf32>
    %46 = arith.addf %43, %45 : vector<8x32xf32>
    %47 = vector.extract_strided_slice %39 {offsets = [0, 64], sizes = [8, 32], strides = [1, 1]} : vector<8x96xf32> to vector<8x32xf32>
    %48 = math.tanh %46 : vector<8x32xf32>
    %49 = arith.mulf %47, %48 : vector<8x32xf32>
    %c8_21 = arith.constant 8 : index
    %c0_22 = arith.constant 0 : index
    %50 = vector.load %arg14[%c8_21, %c0_22] : memref<64x32xf32, #tpu.memory_space<vmem>>, vector<8x32xf32>
    tpu.vector_store %arg14[%c8_21, %c0_22], %49 {strides = array<i32>} : memref<64x32xf32, #tpu.memory_space<vmem>>, vector<8x32xf32>,
    %c16 = arith.constant 16 : index
    %c0_23 = arith.constant 0 : index
    %51 = vector.load %arg13[%c16, %c0_23] : memref<64x128xf32, #tpu.memory_space<vmem>>, vector<8x128xf32>
    %cst_24 = arith.constant dense<0.000000e+00> : vector<8x128xf32>
    %52 = tpu.matmul %49, %1, %cst_24 {dimension_numbers = #tpu.dot_dimension_numbers<[1], [0], [0], [1], [0, 0, 1, 1], [], []>} : vector<8x32xf32>, vector<32x128xf32>, vector<8x128xf32> -> vector<8x128xf32>
    %53 = arith.addf %51, %52 : vector<8x128xf32>
    %54 = vector.extract_strided_slice %53 {offsets = [0, 0], sizes = [8, 96], strides = [1, 1]} : vector<8x128xf32> to vector<8x96xf32>
    %55 = arith.negf %54 : vector<8x96xf32>
    %56 = math.exp %55 : vector<8x96xf32>
    %cst_25 = arith.constant 1.000000e+00 : f32
    %57 = vector.broadcast %cst_25 : f32 to vector<8x96xf32>
    %58 = arith.addf %57, %56 : vector<8x96xf32>
    %59 = arith.divf %57, %58 : vector<8x96xf32>
    %60 = vector.extract_strided_slice %53 {offsets = [0, 96], sizes = [8, 32], strides = [1, 1]} : vector<8x128xf32> to vector<8x32xf32>
    %61 = math.tanh %60 : vector<8x32xf32>
    %62 = vector.extract_strided_slice %59 {offsets = [0, 32], sizes = [8, 32], strides = [1, 1]} : vector<8x96xf32> to vector<8x32xf32>
    %63 = arith.mulf %62, %46 : vector<8x32xf32>
    %64 = vector.extract_strided_slice %59 {offsets = [0, 0], sizes = [8, 32], strides = [1, 1]} : vector<8x96xf32> to vector<8x32xf32>
    %65 = arith.mulf %64, %61 : vector<8x32xf32>
    %66 = arith.addf %63, %65 : vector<8x32xf32>
    %67 = vector.extract_strided_slice %59 {offsets = [0, 64], sizes = [8, 32], strides = [1, 1]} : vector<8x96xf32> to vector<8x32xf32>
    %68 = math.tanh %66 : vector<8x32xf32>
    %69 = arith.mulf %67, %68 : vector<8x32xf32>
    %c16_26 = arith.constant 16 : index
    %c0_27 = arith.constant 0 : index
    %70 = vector.load %arg14[%c16_26, %c0_27] : memref<64x32xf32, #tpu.memory_space<vmem>>, vector<8x32xf32>
    tpu.vector_store %arg14[%c16_26, %c0_27], %69 {strides = array<i32>} : memref<64x32xf32, #tpu.memory_space<vmem>>, vector<8x32xf32>,
    %c24 = arith.constant 24 : index
    %c0_28 = arith.constant 0 : index
    %71 = vector.load %arg13[%c24, %c0_28] : memref<64x128xf32, #tpu.memory_space<vmem>>, vector<8x128xf32>
    %cst_29 = arith.constant dense<0.000000e+00> : vector<8x128xf32>
    %72 = tpu.matmul %69, %1, %cst_29 {dimension_numbers = #tpu.dot_dimension_numbers<[1], [0], [0], [1], [0, 0, 1, 1], [], []>} : vector<8x32xf32>, vector<32x128xf32>, vector<8x128xf32> -> vector<8x128xf32>
    %73 = arith.addf %71, %72 : vector<8x128xf32>
    %74 = vector.extract_strided_slice %73 {offsets = [0, 0], sizes = [8, 96], strides = [1, 1]} : vector<8x128xf32> to vector<8x96xf32>
    %75 = arith.negf %74 : vector<8x96xf32>
    %76 = math.exp %75 : vector<8x96xf32>
    %cst_30 = arith.constant 1.000000e+00 : f32
    %77 = vector.broadcast %cst_30 : f32 to vector<8x96xf32>
    %78 = arith.addf %77, %76 : vector<8x96xf32>
    %79 = arith.divf %77, %78 : vector<8x96xf32>
    %80 = vector.extract_strided_slice %73 {offsets = [0, 96], sizes = [8, 32], strides = [1, 1]} : vector<8x128xf32> to vector<8x32xf32>
    %81 = math.tanh %80 : vector<8x32xf32>
    %82 = vector.extract_strided_slice %79 {offsets = [0, 32], sizes = [8, 32], strides = [1, 1]} : vector<8x96xf32> to vector<8x32xf32>
    %83 = arith.mulf %82, %66 : vector<8x32xf32>
    %84 = vector.extract_strided_slice %79 {offsets = [0, 0], sizes = [8, 32], strides = [1, 1]} : vector<8x96xf32> to vector<8x32xf32>
    %85 = arith.mulf %84, %81 : vector<8x32xf32>
    %86 = arith.addf %83, %85 : vector<8x32xf32>
    %87 = vector.extract_strided_slice %79 {offsets = [0, 64], sizes = [8, 32], strides = [1, 1]} : vector<8x96xf32> to vector<8x32xf32>
    %88 = math.tanh %86 : vector<8x32xf32>
    %89 = arith.mulf %87, %88 : vector<8x32xf32>
    %c24_31 = arith.constant 24 : index
    %c0_32 = arith.constant 0 : index
    %90 = vector.load %arg14[%c24_31, %c0_32] : memref<64x32xf32, #tpu.memory_space<vmem>>, vector<8x32xf32>
    tpu.vector_store %arg14[%c24_31, %c0_32], %89 {strides = array<i32>} : memref<64x32xf32, #tpu.memory_space<vmem>>, vector<8x32xf32>,
    %c32 = arith.constant 32 : index
    %c0_33 = arith.constant 0 : index
    %91 = vector.load %arg13[%c32, %c0_33] : memref<64x128xf32, #tpu.memory_space<vmem>>, vector<8x128xf32>
    %cst_34 = arith.constant dense<0.000000e+00> : vector<8x128xf32>
    %92 = tpu.matmul %89, %1, %cst_34 {dimension_numbers = #tpu.dot_dimension_numbers<[1], [0], [0], [1], [0, 0, 1, 1], [], []>} : vector<8x32xf32>, vector<32x128xf32>, vector<8x128xf32> -> vector<8x128xf32>
    %93 = arith.addf %91, %92 : vector<8x128xf32>
    %94 = vector.extract_strided_slice %93 {offsets = [0, 0], sizes = [8, 96], strides = [1, 1]} : vector<8x128xf32> to vector<8x96xf32>
    %95 = arith.negf %94 : vector<8x96xf32>
    %96 = math.exp %95 : vector<8x96xf32>
    %cst_35 = arith.constant 1.000000e+00 : f32
    %97 = vector.broadcast %cst_35 : f32 to vector<8x96xf32>
    %98 = arith.addf %97, %96 : vector<8x96xf32>
    %99 = arith.divf %97, %98 : vector<8x96xf32>
    %100 = vector.extract_strided_slice %93 {offsets = [0, 96], sizes = [8, 32], strides = [1, 1]} : vector<8x128xf32> to vector<8x32xf32>
    %101 = math.tanh %100 : vector<8x32xf32>
    %102 = vector.extract_strided_slice %99 {offsets = [0, 32], sizes = [8, 32], strides = [1, 1]} : vector<8x96xf32> to vector<8x32xf32>
    %103 = arith.mulf %102, %86 : vector<8x32xf32>
    %104 = vector.extract_strided_slice %99 {offsets = [0, 0], sizes = [8, 32], strides = [1, 1]} : vector<8x96xf32> to vector<8x32xf32>
    %105 = arith.mulf %104, %101 : vector<8x32xf32>
    %106 = arith.addf %103, %105 : vector<8x32xf32>
    %107 = vector.extract_strided_slice %99 {offsets = [0, 64], sizes = [8, 32], strides = [1, 1]} : vector<8x96xf32> to vector<8x32xf32>
    %108 = math.tanh %106 : vector<8x32xf32>
    %109 = arith.mulf %107, %108 : vector<8x32xf32>
    %c32_36 = arith.constant 32 : index
    %c0_37 = arith.constant 0 : index
    %110 = vector.load %arg14[%c32_36, %c0_37] : memref<64x32xf32, #tpu.memory_space<vmem>>, vector<8x32xf32>
    tpu.vector_store %arg14[%c32_36, %c0_37], %109 {strides = array<i32>} : memref<64x32xf32, #tpu.memory_space<vmem>>, vector<8x32xf32>,
    %c40 = arith.constant 40 : index
    %c0_38 = arith.constant 0 : index
    %111 = vector.load %arg13[%c40, %c0_38] : memref<64x128xf32, #tpu.memory_space<vmem>>, vector<8x128xf32>
    %cst_39 = arith.constant dense<0.000000e+00> : vector<8x128xf32>
    %112 = tpu.matmul %109, %1, %cst_39 {dimension_numbers = #tpu.dot_dimension_numbers<[1], [0], [0], [1], [0, 0, 1, 1], [], []>} : vector<8x32xf32>, vector<32x128xf32>, vector<8x128xf32> -> vector<8x128xf32>
    %113 = arith.addf %111, %112 : vector<8x128xf32>
    %114 = vector.extract_strided_slice %113 {offsets = [0, 0], sizes = [8, 96], strides = [1, 1]} : vector<8x128xf32> to vector<8x96xf32>
    %115 = arith.negf %114 : vector<8x96xf32>
    %116 = math.exp %115 : vector<8x96xf32>
    %cst_40 = arith.constant 1.000000e+00 : f32
    %117 = vector.broadcast %cst_40 : f32 to vector<8x96xf32>
    %118 = arith.addf %117, %116 : vector<8x96xf32>
    %119 = arith.divf %117, %118 : vector<8x96xf32>
    %120 = vector.extract_strided_slice %113 {offsets = [0, 96], sizes = [8, 32], strides = [1, 1]} : vector<8x128xf32> to vector<8x32xf32>
    %121 = math.tanh %120 : vector<8x32xf32>
    %122 = vector.extract_strided_slice %119 {offsets = [0, 32], sizes = [8, 32], strides = [1, 1]} : vector<8x96xf32> to vector<8x32xf32>
    %123 = arith.mulf %122, %106 : vector<8x32xf32>
    %124 = vector.extract_strided_slice %119 {offsets = [0, 0], sizes = [8, 32], strides = [1, 1]} : vector<8x96xf32> to vector<8x32xf32>
    %125 = arith.mulf %124, %121 : vector<8x32xf32>
    %126 = arith.addf %123, %125 : vector<8x32xf32>
    %127 = vector.extract_strided_slice %119 {offsets = [0, 64], sizes = [8, 32], strides = [1, 1]} : vector<8x96xf32> to vector<8x32xf32>
    %128 = math.tanh %126 : vector<8x32xf32>
    %129 = arith.mulf %127, %128 : vector<8x32xf32>
    %c40_41 = arith.constant 40 : index
    %c0_42 = arith.constant 0 : index
    %130 = vector.load %arg14[%c40_41, %c0_42] : memref<64x32xf32, #tpu.memory_space<vmem>>, vector<8x32xf32>
    tpu.vector_store %arg14[%c40_41, %c0_42], %129 {strides = array<i32>} : memref<64x32xf32, #tpu.memory_space<vmem>>, vector<8x32xf32>,
    %c48 = arith.constant 48 : index
    %c0_43 = arith.constant 0 : index
    %131 = vector.load %arg13[%c48, %c0_43] : memref<64x128xf32, #tpu.memory_space<vmem>>, vector<8x128xf32>
    %cst_44 = arith.constant dense<0.000000e+00> : vector<8x128xf32>
    %132 = tpu.matmul %129, %1, %cst_44 {dimension_numbers = #tpu.dot_dimension_numbers<[1], [0], [0], [1], [0, 0, 1, 1], [], []>} : vector<8x32xf32>, vector<32x128xf32>, vector<8x128xf32> -> vector<8x128xf32>
    %133 = arith.addf %131, %132 : vector<8x128xf32>
    %134 = vector.extract_strided_slice %133 {offsets = [0, 0], sizes = [8, 96], strides = [1, 1]} : vector<8x128xf32> to vector<8x96xf32>
    %135 = arith.negf %134 : vector<8x96xf32>
    %136 = math.exp %135 : vector<8x96xf32>
    %cst_45 = arith.constant 1.000000e+00 : f32
    %137 = vector.broadcast %cst_45 : f32 to vector<8x96xf32>
    %138 = arith.addf %137, %136 : vector<8x96xf32>
    %139 = arith.divf %137, %138 : vector<8x96xf32>
    %140 = vector.extract_strided_slice %133 {offsets = [0, 96], sizes = [8, 32], strides = [1, 1]} : vector<8x128xf32> to vector<8x32xf32>
    %141 = math.tanh %140 : vector<8x32xf32>
    %142 = vector.extract_strided_slice %139 {offsets = [0, 32], sizes = [8, 32], strides = [1, 1]} : vector<8x96xf32> to vector<8x32xf32>
    %143 = arith.mulf %142, %126 : vector<8x32xf32>
    %144 = vector.extract_strided_slice %139 {offsets = [0, 0], sizes = [8, 32], strides = [1, 1]} : vector<8x96xf32> to vector<8x32xf32>
    %145 = arith.mulf %144, %141 : vector<8x32xf32>
    %146 = arith.addf %143, %145 : vector<8x32xf32>
    %147 = vector.extract_strided_slice %139 {offsets = [0, 64], sizes = [8, 32], strides = [1, 1]} : vector<8x96xf32> to vector<8x32xf32>
    %148 = math.tanh %146 : vector<8x32xf32>
    %149 = arith.mulf %147, %148 : vector<8x32xf32>
    %c48_46 = arith.constant 48 : index
    %c0_47 = arith.constant 0 : index
    %150 = vector.load %arg14[%c48_46, %c0_47] : memref<64x32xf32, #tpu.memory_space<vmem>>, vector<8x32xf32>
    tpu.vector_store %arg14[%c48_46, %c0_47], %149 {strides = array<i32>} : memref<64x32xf32, #tpu.memory_space<vmem>>, vector<8x32xf32>,
    %c56 = arith.constant 56 : index
    %c0_48 = arith.constant 0 : index
    %151 = vector.load %arg13[%c56, %c0_48] : memref<64x128xf32, #tpu.memory_space<vmem>>, vector<8x128xf32>
    %cst_49 = arith.constant dense<0.000000e+00> : vector<8x128xf32>
    %152 = tpu.matmul %149, %1, %cst_49 {dimension_numbers = #tpu.dot_dimension_numbers<[1], [0], [0], [1], [0, 0, 1, 1], [], []>} : vector<8x32xf32>, vector<32x128xf32>, vector<8x128xf32> -> vector<8x128xf32>
    %153 = arith.addf %151, %152 : vector<8x128xf32>
    %154 = vector.extract_strided_slice %153 {offsets = [0, 0], sizes = [8, 96], strides = [1, 1]} : vector<8x128xf32> to vector<8x96xf32>
    %155 = arith.negf %154 : vector<8x96xf32>
    %156 = math.exp %155 : vector<8x96xf32>
    %cst_50 = arith.constant 1.000000e+00 : f32
    %157 = vector.broadcast %cst_50 : f32 to vector<8x96xf32>
    %158 = arith.addf %157, %156 : vector<8x96xf32>
    %159 = arith.divf %157, %158 : vector<8x96xf32>
    %160 = vector.extract_strided_slice %153 {offsets = [0, 96], sizes = [8, 32], strides = [1, 1]} : vector<8x128xf32> to vector<8x32xf32>
    %161 = math.tanh %160 : vector<8x32xf32>
    %162 = vector.extract_strided_slice %159 {offsets = [0, 32], sizes = [8, 32], strides = [1, 1]} : vector<8x96xf32> to vector<8x32xf32>
    %163 = arith.mulf %162, %146 : vector<8x32xf32>
    %164 = vector.extract_strided_slice %159 {offsets = [0, 0], sizes = [8, 32], strides = [1, 1]} : vector<8x96xf32> to vector<8x32xf32>
    %165 = arith.mulf %164, %161 : vector<8x32xf32>
    %166 = arith.addf %163, %165 : vector<8x32xf32>
    %167 = vector.extract_strided_slice %159 {offsets = [0, 64], sizes = [8, 32], strides = [1, 1]} : vector<8x96xf32> to vector<8x32xf32>
    %168 = math.tanh %166 : vector<8x32xf32>
    %169 = arith.mulf %167, %168 : vector<8x32xf32>
    %c56_51 = arith.constant 56 : index
    %c0_52 = arith.constant 0 : index
    %170 = vector.load %arg14[%c56_51, %c0_52] : memref<64x32xf32, #tpu.memory_space<vmem>>, vector<8x32xf32>
    tpu.vector_store %arg14[%c56_51, %c0_52], %169 {strides = array<i32>} : memref<64x32xf32, #tpu.memory_space<vmem>>, vector<8x32xf32>,
    %c0_53 = arith.constant 0 : index
    %c0_54 = arith.constant 0 : index
    %171 = vector.load %arg5[%c0_53, %c0_54] : memref<32x128xf32, #tpu.memory_space<vmem>>, vector<32x128xf32>
    %c0_55 = arith.constant 0 : index
    %c0_56 = arith.constant 0 : index
    %172 = vector.load %arg6[%c0_55, %c0_56] : memref<32x128xf32, #tpu.memory_space<vmem>>, vector<32x128xf32>
    %c0_57 = arith.constant 0 : index
    %c0_58 = arith.constant 0 : index
    %173 = vector.load %arg7[%c0_57, %c0_58] : memref<1x128xf32, #tpu.memory_space<vmem>>, vector<1x128xf32>
    %c0_59 = arith.constant 0 : index
    %c0_60 = arith.constant 0 : index
    %174 = vector.load %arg14[%c0_59, %c0_60] : memref<64x32xf32, #tpu.memory_space<vmem>>, vector<64x32xf32>
    %cst_61 = arith.constant dense<0.000000e+00> : vector<64x128xf32>
    %175 = tpu.matmul %174, %171, %cst_61 {dimension_numbers = #tpu.dot_dimension_numbers<[1], [0], [0], [1], [0, 0, 1, 1], [], []>} : vector<64x32xf32>, vector<32x128xf32>, vector<64x128xf32> -> vector<64x128xf32>
    %176 = vector.broadcast %173 : vector<1x128xf32> to vector<64x128xf32>
    %177 = arith.addf %175, %176 : vector<64x128xf32>
    %c0_62 = arith.constant 0 : index
    %c0_63 = arith.constant 0 : index
    %178 = vector.load %arg13[%c0_62, %c0_63] : memref<64x128xf32, #tpu.memory_space<vmem>>, vector<64x128xf32>
    tpu.vector_store %arg13[%c0_62, %c0_63], %177 {strides = array<i32>} : memref<64x128xf32, #tpu.memory_space<vmem>>, vector<64x128xf32>,
    %cst_64 = arith.constant 0.000000e+00 : f32
    %179 = vector.broadcast %cst_64 : f32 to vector<8x32xf32>
    %cst_65 = arith.constant 0.000000e+00 : f32
    %180 = vector.broadcast %cst_65 : f32 to vector<8x32xf32>
    %c0_66 = arith.constant 0 : index
    %c0_67 = arith.constant 0 : index
    %181 = vector.load %arg13[%c0_66, %c0_67] : memref<64x128xf32, #tpu.memory_space<vmem>>, vector<8x128xf32>
    %cst_68 = arith.constant dense<0.000000e+00> : vector<8x128xf32>
    %182 = tpu.matmul %179, %172, %cst_68 {dimension_numbers = #tpu.dot_dimension_numbers<[1], [0], [0], [1], [0, 0, 1, 1], [], []>} : vector<8x32xf32>, vector<32x128xf32>, vector<8x128xf32> -> vector<8x128xf32>
    %183 = arith.addf %181, %182 : vector<8x128xf32>
    %184 = vector.extract_strided_slice %183 {offsets = [0, 0], sizes = [8, 96], strides = [1, 1]} : vector<8x128xf32> to vector<8x96xf32>
    %185 = arith.negf %184 : vector<8x96xf32>
    %186 = math.exp %185 : vector<8x96xf32>
    %cst_69 = arith.constant 1.000000e+00 : f32
    %187 = vector.broadcast %cst_69 : f32 to vector<8x96xf32>
    %188 = arith.addf %187, %186 : vector<8x96xf32>
    %189 = arith.divf %187, %188 : vector<8x96xf32>
    %190 = vector.extract_strided_slice %183 {offsets = [0, 96], sizes = [8, 32], strides = [1, 1]} : vector<8x128xf32> to vector<8x32xf32>
    %191 = math.tanh %190 : vector<8x32xf32>
    %192 = vector.extract_strided_slice %189 {offsets = [0, 32], sizes = [8, 32], strides = [1, 1]} : vector<8x96xf32> to vector<8x32xf32>
    %193 = arith.mulf %192, %180 : vector<8x32xf32>
    %194 = vector.extract_strided_slice %189 {offsets = [0, 0], sizes = [8, 32], strides = [1, 1]} : vector<8x96xf32> to vector<8x32xf32>
    %195 = arith.mulf %194, %191 : vector<8x32xf32>
    %196 = arith.addf %193, %195 : vector<8x32xf32>
    %197 = vector.extract_strided_slice %189 {offsets = [0, 64], sizes = [8, 32], strides = [1, 1]} : vector<8x96xf32> to vector<8x32xf32>
    %198 = math.tanh %196 : vector<8x32xf32>
    %199 = arith.mulf %197, %198 : vector<8x32xf32>
    %c8_70 = arith.constant 8 : index
    %c0_71 = arith.constant 0 : index
    %200 = vector.load %arg13[%c8_70, %c0_71] : memref<64x128xf32, #tpu.memory_space<vmem>>, vector<8x128xf32>
    %cst_72 = arith.constant dense<0.000000e+00> : vector<8x128xf32>
    %201 = tpu.matmul %199, %172, %cst_72 {dimension_numbers = #tpu.dot_dimension_numbers<[1], [0], [0], [1], [0, 0, 1, 1], [], []>} : vector<8x32xf32>, vector<32x128xf32>, vector<8x128xf32> -> vector<8x128xf32>
    %202 = arith.addf %200, %201 : vector<8x128xf32>
    %203 = vector.extract_strided_slice %202 {offsets = [0, 0], sizes = [8, 96], strides = [1, 1]} : vector<8x128xf32> to vector<8x96xf32>
    %204 = arith.negf %203 : vector<8x96xf32>
    %205 = math.exp %204 : vector<8x96xf32>
    %cst_73 = arith.constant 1.000000e+00 : f32
    %206 = vector.broadcast %cst_73 : f32 to vector<8x96xf32>
    %207 = arith.addf %206, %205 : vector<8x96xf32>
    %208 = arith.divf %206, %207 : vector<8x96xf32>
    %209 = vector.extract_strided_slice %202 {offsets = [0, 96], sizes = [8, 32], strides = [1, 1]} : vector<8x128xf32> to vector<8x32xf32>
    %210 = math.tanh %209 : vector<8x32xf32>
    %211 = vector.extract_strided_slice %208 {offsets = [0, 32], sizes = [8, 32], strides = [1, 1]} : vector<8x96xf32> to vector<8x32xf32>
    %212 = arith.mulf %211, %196 : vector<8x32xf32>
    %213 = vector.extract_strided_slice %208 {offsets = [0, 0], sizes = [8, 32], strides = [1, 1]} : vector<8x96xf32> to vector<8x32xf32>
    %214 = arith.mulf %213, %210 : vector<8x32xf32>
    %215 = arith.addf %212, %214 : vector<8x32xf32>
    %216 = vector.extract_strided_slice %208 {offsets = [0, 64], sizes = [8, 32], strides = [1, 1]} : vector<8x96xf32> to vector<8x32xf32>
    %217 = math.tanh %215 : vector<8x32xf32>
    %218 = arith.mulf %216, %217 : vector<8x32xf32>
    %c16_74 = arith.constant 16 : index
    %c0_75 = arith.constant 0 : index
    %219 = vector.load %arg13[%c16_74, %c0_75] : memref<64x128xf32, #tpu.memory_space<vmem>>, vector<8x128xf32>
    %cst_76 = arith.constant dense<0.000000e+00> : vector<8x128xf32>
    %220 = tpu.matmul %218, %172, %cst_76 {dimension_numbers = #tpu.dot_dimension_numbers<[1], [0], [0], [1], [0, 0, 1, 1], [], []>} : vector<8x32xf32>, vector<32x128xf32>, vector<8x128xf32> -> vector<8x128xf32>
    %221 = arith.addf %219, %220 : vector<8x128xf32>
    %222 = vector.extract_strided_slice %221 {offsets = [0, 0], sizes = [8, 96], strides = [1, 1]} : vector<8x128xf32> to vector<8x96xf32>
    %223 = arith.negf %222 : vector<8x96xf32>
    %224 = math.exp %223 : vector<8x96xf32>
    %cst_77 = arith.constant 1.000000e+00 : f32
    %225 = vector.broadcast %cst_77 : f32 to vector<8x96xf32>
    %226 = arith.addf %225, %224 : vector<8x96xf32>
    %227 = arith.divf %225, %226 : vector<8x96xf32>
    %228 = vector.extract_strided_slice %221 {offsets = [0, 96], sizes = [8, 32], strides = [1, 1]} : vector<8x128xf32> to vector<8x32xf32>
    %229 = math.tanh %228 : vector<8x32xf32>
    %230 = vector.extract_strided_slice %227 {offsets = [0, 32], sizes = [8, 32], strides = [1, 1]} : vector<8x96xf32> to vector<8x32xf32>
    %231 = arith.mulf %230, %215 : vector<8x32xf32>
    %232 = vector.extract_strided_slice %227 {offsets = [0, 0], sizes = [8, 32], strides = [1, 1]} : vector<8x96xf32> to vector<8x32xf32>
    %233 = arith.mulf %232, %229 : vector<8x32xf32>
    %234 = arith.addf %231, %233 : vector<8x32xf32>
    %235 = vector.extract_strided_slice %227 {offsets = [0, 64], sizes = [8, 32], strides = [1, 1]} : vector<8x96xf32> to vector<8x32xf32>
    %236 = math.tanh %234 : vector<8x32xf32>
    %237 = arith.mulf %235, %236 : vector<8x32xf32>
    %c24_78 = arith.constant 24 : index
    %c0_79 = arith.constant 0 : index
    %238 = vector.load %arg13[%c24_78, %c0_79] : memref<64x128xf32, #tpu.memory_space<vmem>>, vector<8x128xf32>
    %cst_80 = arith.constant dense<0.000000e+00> : vector<8x128xf32>
    %239 = tpu.matmul %237, %172, %cst_80 {dimension_numbers = #tpu.dot_dimension_numbers<[1], [0], [0], [1], [0, 0, 1, 1], [], []>} : vector<8x32xf32>, vector<32x128xf32>, vector<8x128xf32> -> vector<8x128xf32>
    %240 = arith.addf %238, %239 : vector<8x128xf32>
    %241 = vector.extract_strided_slice %240 {offsets = [0, 0], sizes = [8, 96], strides = [1, 1]} : vector<8x128xf32> to vector<8x96xf32>
    %242 = arith.negf %241 : vector<8x96xf32>
    %243 = math.exp %242 : vector<8x96xf32>
    %cst_81 = arith.constant 1.000000e+00 : f32
    %244 = vector.broadcast %cst_81 : f32 to vector<8x96xf32>
    %245 = arith.addf %244, %243 : vector<8x96xf32>
    %246 = arith.divf %244, %245 : vector<8x96xf32>
    %247 = vector.extract_strided_slice %240 {offsets = [0, 96], sizes = [8, 32], strides = [1, 1]} : vector<8x128xf32> to vector<8x32xf32>
    %248 = math.tanh %247 : vector<8x32xf32>
    %249 = vector.extract_strided_slice %246 {offsets = [0, 32], sizes = [8, 32], strides = [1, 1]} : vector<8x96xf32> to vector<8x32xf32>
    %250 = arith.mulf %249, %234 : vector<8x32xf32>
    %251 = vector.extract_strided_slice %246 {offsets = [0, 0], sizes = [8, 32], strides = [1, 1]} : vector<8x96xf32> to vector<8x32xf32>
    %252 = arith.mulf %251, %248 : vector<8x32xf32>
    %253 = arith.addf %250, %252 : vector<8x32xf32>
    %254 = vector.extract_strided_slice %246 {offsets = [0, 64], sizes = [8, 32], strides = [1, 1]} : vector<8x96xf32> to vector<8x32xf32>
    %255 = math.tanh %253 : vector<8x32xf32>
    %256 = arith.mulf %254, %255 : vector<8x32xf32>
    %c32_82 = arith.constant 32 : index
    %c0_83 = arith.constant 0 : index
    %257 = vector.load %arg13[%c32_82, %c0_83] : memref<64x128xf32, #tpu.memory_space<vmem>>, vector<8x128xf32>
    %cst_84 = arith.constant dense<0.000000e+00> : vector<8x128xf32>
    %258 = tpu.matmul %256, %172, %cst_84 {dimension_numbers = #tpu.dot_dimension_numbers<[1], [0], [0], [1], [0, 0, 1, 1], [], []>} : vector<8x32xf32>, vector<32x128xf32>, vector<8x128xf32> -> vector<8x128xf32>
    %259 = arith.addf %257, %258 : vector<8x128xf32>
    %260 = vector.extract_strided_slice %259 {offsets = [0, 0], sizes = [8, 96], strides = [1, 1]} : vector<8x128xf32> to vector<8x96xf32>
    %261 = arith.negf %260 : vector<8x96xf32>
    %262 = math.exp %261 : vector<8x96xf32>
    %cst_85 = arith.constant 1.000000e+00 : f32
    %263 = vector.broadcast %cst_85 : f32 to vector<8x96xf32>
    %264 = arith.addf %263, %262 : vector<8x96xf32>
    %265 = arith.divf %263, %264 : vector<8x96xf32>
    %266 = vector.extract_strided_slice %259 {offsets = [0, 96], sizes = [8, 32], strides = [1, 1]} : vector<8x128xf32> to vector<8x32xf32>
    %267 = math.tanh %266 : vector<8x32xf32>
    %268 = vector.extract_strided_slice %265 {offsets = [0, 32], sizes = [8, 32], strides = [1, 1]} : vector<8x96xf32> to vector<8x32xf32>
    %269 = arith.mulf %268, %253 : vector<8x32xf32>
    %270 = vector.extract_strided_slice %265 {offsets = [0, 0], sizes = [8, 32], strides = [1, 1]} : vector<8x96xf32> to vector<8x32xf32>
    %271 = arith.mulf %270, %267 : vector<8x32xf32>
    %272 = arith.addf %269, %271 : vector<8x32xf32>
    %273 = vector.extract_strided_slice %265 {offsets = [0, 64], sizes = [8, 32], strides = [1, 1]} : vector<8x96xf32> to vector<8x32xf32>
    %274 = math.tanh %272 : vector<8x32xf32>
    %275 = arith.mulf %273, %274 : vector<8x32xf32>
    %c40_86 = arith.constant 40 : index
    %c0_87 = arith.constant 0 : index
    %276 = vector.load %arg13[%c40_86, %c0_87] : memref<64x128xf32, #tpu.memory_space<vmem>>, vector<8x128xf32>
    %cst_88 = arith.constant dense<0.000000e+00> : vector<8x128xf32>
    %277 = tpu.matmul %275, %172, %cst_88 {dimension_numbers = #tpu.dot_dimension_numbers<[1], [0], [0], [1], [0, 0, 1, 1], [], []>} : vector<8x32xf32>, vector<32x128xf32>, vector<8x128xf32> -> vector<8x128xf32>
    %278 = arith.addf %276, %277 : vector<8x128xf32>
    %279 = vector.extract_strided_slice %278 {offsets = [0, 0], sizes = [8, 96], strides = [1, 1]} : vector<8x128xf32> to vector<8x96xf32>
    %280 = arith.negf %279 : vector<8x96xf32>
    %281 = math.exp %280 : vector<8x96xf32>
    %cst_89 = arith.constant 1.000000e+00 : f32
    %282 = vector.broadcast %cst_89 : f32 to vector<8x96xf32>
    %283 = arith.addf %282, %281 : vector<8x96xf32>
    %284 = arith.divf %282, %283 : vector<8x96xf32>
    %285 = vector.extract_strided_slice %278 {offsets = [0, 96], sizes = [8, 32], strides = [1, 1]} : vector<8x128xf32> to vector<8x32xf32>
    %286 = math.tanh %285 : vector<8x32xf32>
    %287 = vector.extract_strided_slice %284 {offsets = [0, 32], sizes = [8, 32], strides = [1, 1]} : vector<8x96xf32> to vector<8x32xf32>
    %288 = arith.mulf %287, %272 : vector<8x32xf32>
    %289 = vector.extract_strided_slice %284 {offsets = [0, 0], sizes = [8, 32], strides = [1, 1]} : vector<8x96xf32> to vector<8x32xf32>
    %290 = arith.mulf %289, %286 : vector<8x32xf32>
    %291 = arith.addf %288, %290 : vector<8x32xf32>
    %292 = vector.extract_strided_slice %284 {offsets = [0, 64], sizes = [8, 32], strides = [1, 1]} : vector<8x96xf32> to vector<8x32xf32>
    %293 = math.tanh %291 : vector<8x32xf32>
    %294 = arith.mulf %292, %293 : vector<8x32xf32>
    %c48_90 = arith.constant 48 : index
    %c0_91 = arith.constant 0 : index
    %295 = vector.load %arg13[%c48_90, %c0_91] : memref<64x128xf32, #tpu.memory_space<vmem>>, vector<8x128xf32>
    %cst_92 = arith.constant dense<0.000000e+00> : vector<8x128xf32>
    %296 = tpu.matmul %294, %172, %cst_92 {dimension_numbers = #tpu.dot_dimension_numbers<[1], [0], [0], [1], [0, 0, 1, 1], [], []>} : vector<8x32xf32>, vector<32x128xf32>, vector<8x128xf32> -> vector<8x128xf32>
    %297 = arith.addf %295, %296 : vector<8x128xf32>
    %298 = vector.extract_strided_slice %297 {offsets = [0, 0], sizes = [8, 96], strides = [1, 1]} : vector<8x128xf32> to vector<8x96xf32>
    %299 = arith.negf %298 : vector<8x96xf32>
    %300 = math.exp %299 : vector<8x96xf32>
    %cst_93 = arith.constant 1.000000e+00 : f32
    %301 = vector.broadcast %cst_93 : f32 to vector<8x96xf32>
    %302 = arith.addf %301, %300 : vector<8x96xf32>
    %303 = arith.divf %301, %302 : vector<8x96xf32>
    %304 = vector.extract_strided_slice %297 {offsets = [0, 96], sizes = [8, 32], strides = [1, 1]} : vector<8x128xf32> to vector<8x32xf32>
    %305 = math.tanh %304 : vector<8x32xf32>
    %306 = vector.extract_strided_slice %303 {offsets = [0, 32], sizes = [8, 32], strides = [1, 1]} : vector<8x96xf32> to vector<8x32xf32>
    %307 = arith.mulf %306, %291 : vector<8x32xf32>
    %308 = vector.extract_strided_slice %303 {offsets = [0, 0], sizes = [8, 32], strides = [1, 1]} : vector<8x96xf32> to vector<8x32xf32>
    %309 = arith.mulf %308, %305 : vector<8x32xf32>
    %310 = arith.addf %307, %309 : vector<8x32xf32>
    %311 = vector.extract_strided_slice %303 {offsets = [0, 64], sizes = [8, 32], strides = [1, 1]} : vector<8x96xf32> to vector<8x32xf32>
    %312 = math.tanh %310 : vector<8x32xf32>
    %313 = arith.mulf %311, %312 : vector<8x32xf32>
    %c56_94 = arith.constant 56 : index
    %c0_95 = arith.constant 0 : index
    %314 = vector.load %arg13[%c56_94, %c0_95] : memref<64x128xf32, #tpu.memory_space<vmem>>, vector<8x128xf32>
    %cst_96 = arith.constant dense<0.000000e+00> : vector<8x128xf32>
    %315 = tpu.matmul %313, %172, %cst_96 {dimension_numbers = #tpu.dot_dimension_numbers<[1], [0], [0], [1], [0, 0, 1, 1], [], []>} : vector<8x32xf32>, vector<32x128xf32>, vector<8x128xf32> -> vector<8x128xf32>
    %316 = arith.addf %314, %315 : vector<8x128xf32>
    %317 = vector.extract_strided_slice %316 {offsets = [0, 0], sizes = [8, 96], strides = [1, 1]} : vector<8x128xf32> to vector<8x96xf32>
    %318 = arith.negf %317 : vector<8x96xf32>
    %319 = math.exp %318 : vector<8x96xf32>
    %cst_97 = arith.constant 1.000000e+00 : f32
    %320 = vector.broadcast %cst_97 : f32 to vector<8x96xf32>
    %321 = arith.addf %320, %319 : vector<8x96xf32>
    %322 = arith.divf %320, %321 : vector<8x96xf32>
    %323 = vector.extract_strided_slice %316 {offsets = [0, 96], sizes = [8, 32], strides = [1, 1]} : vector<8x128xf32> to vector<8x32xf32>
    %324 = math.tanh %323 : vector<8x32xf32>
    %325 = vector.extract_strided_slice %322 {offsets = [0, 32], sizes = [8, 32], strides = [1, 1]} : vector<8x96xf32> to vector<8x32xf32>
    %326 = arith.mulf %325, %310 : vector<8x32xf32>
    %327 = vector.extract_strided_slice %322 {offsets = [0, 0], sizes = [8, 32], strides = [1, 1]} : vector<8x96xf32> to vector<8x32xf32>
    %328 = arith.mulf %327, %324 : vector<8x32xf32>
    %329 = arith.addf %326, %328 : vector<8x32xf32>
    %330 = vector.extract_strided_slice %322 {offsets = [0, 64], sizes = [8, 32], strides = [1, 1]} : vector<8x96xf32> to vector<8x32xf32>
    %331 = math.tanh %329 : vector<8x32xf32>
    %332 = arith.mulf %330, %331 : vector<8x32xf32>
    %c0_98 = arith.constant 0 : index
    %c0_99 = arith.constant 0 : index
    %333 = vector.load %arg8[%c0_98, %c0_99] : memref<32x32xf32, #tpu.memory_space<vmem>>, vector<32x32xf32>
    %cst_100 = arith.constant dense<0.000000e+00> : vector<8x32xf32>
    %334 = tpu.matmul %332, %333, %cst_100 {dimension_numbers = #tpu.dot_dimension_numbers<[1], [0], [0], [1], [0, 0, 1, 1], [], []>} : vector<8x32xf32>, vector<32x32xf32>, vector<8x32xf32> -> vector<8x32xf32>
    %c0_101 = arith.constant 0 : index
    %c0_102 = arith.constant 0 : index
    %335 = vector.load %arg9[%c0_101, %c0_102] : memref<1x32xf32, #tpu.memory_space<vmem>>, vector<1x32xf32>
    %336 = vector.broadcast %335 : vector<1x32xf32> to vector<8x32xf32>
    %337 = arith.addf %334, %336 : vector<8x32xf32>
    %cst_103 = arith.constant 0.000000e+00 : f32
    %338 = vector.broadcast %cst_103 : f32 to vector<8x32xf32>
    %339 = arith.maximumf %337, %338 : vector<8x32xf32>
    %c0_104 = arith.constant 0 : index
    %c0_105 = arith.constant 0 : index
    %340 = vector.load %arg10[%c0_104, %c0_105] : memref<32x4xf32, #tpu.memory_space<vmem>>, vector<32x4xf32>
    %cst_106 = arith.constant dense<0.000000e+00> : vector<8x4xf32>
    %341 = tpu.matmul %339, %340, %cst_106 {dimension_numbers = #tpu.dot_dimension_numbers<[1], [0], [0], [1], [0, 0, 1, 1], [], []>} : vector<8x32xf32>, vector<32x4xf32>, vector<8x4xf32> -> vector<8x4xf32>
    %c0_107 = arith.constant 0 : index
    %c0_108 = arith.constant 0 : index
    %342 = vector.load %arg11[%c0_107, %c0_108] : memref<1x4xf32, #tpu.memory_space<vmem>>, vector<1x4xf32>
    %343 = vector.broadcast %342 : vector<1x4xf32> to vector<8x4xf32>
    %344 = arith.addf %341, %343 : vector<8x4xf32>
    %345 = arith.negf %344 : vector<8x4xf32>
    %346 = math.exp %345 : vector<8x4xf32>
    %cst_109 = arith.constant 1.000000e+00 : f32
    %347 = vector.broadcast %cst_109 : f32 to vector<8x4xf32>
    %348 = arith.addf %347, %346 : vector<8x4xf32>
    %349 = arith.divf %347, %348 : vector<8x4xf32>
    %c0_110 = arith.constant 0 : index
    %c0_111 = arith.constant 0 : index
    %350 = vector.load %arg12[%c0_110, %c0_111] : memref<8x4xf32, #tpu.memory_space<vmem>>, vector<8x4xf32>
    tpu.vector_store %arg12[%c0_110, %c0_111], %349 {strides = array<i32>} : memref<8x4xf32, #tpu.memory_space<vmem>>, vector<8x4xf32>,
    return
  }
  func.func @transform_0(%arg0: i32) -> (i32, i32, i32) {
    %c0_i32 = arith.constant 0 : i32
    %c0_i32_0 = arith.constant 0 : i32
    %c0_i32_1 = arith.constant 0 : i32
    return %arg0, %c0_i32, %c0_i32_0 : i32, i32, i32
  }
  func.func @transform_1(%arg0: i32) -> (i32, i32) {
    %c0_i32 = arith.constant 0 : i32
    %c0_i32_0 = arith.constant 0 : i32
    %c0_i32_1 = arith.constant 0 : i32
    return %c0_i32, %c0_i32_0 : i32, i32
  }
  func.func @transform_2(%arg0: i32) -> (i32, i32) {
    %c0_i32 = arith.constant 0 : i32
    %c0_i32_0 = arith.constant 0 : i32
    %c0_i32_1 = arith.constant 0 : i32
    return %c0_i32, %c0_i32_0 : i32, i32
  }
  func.func @transform_3(%arg0: i32) -> (i32, i32) {
    %c0_i32 = arith.constant 0 : i32
    %c0_i32_0 = arith.constant 0 : i32
    %c0_i32_1 = arith.constant 0 : i32
    return %c0_i32, %c0_i32_0 : i32, i32
  }
  func.func @transform_4(%arg0: i32) -> (i32, i32) {
    %c0_i32 = arith.constant 0 : i32
    %c0_i32_0 = arith.constant 0 : i32
    %c0_i32_1 = arith.constant 0 : i32
    return %c0_i32, %c0_i32_0 : i32, i32
  }
  func.func @transform_5(%arg0: i32) -> (i32, i32) {
    %c0_i32 = arith.constant 0 : i32
    %c0_i32_0 = arith.constant 0 : i32
    %c0_i32_1 = arith.constant 0 : i32
    return %c0_i32, %c0_i32_0 : i32, i32
  }
  func.func @transform_6(%arg0: i32) -> (i32, i32) {
    %c0_i32 = arith.constant 0 : i32
    %c0_i32_0 = arith.constant 0 : i32
    %c0_i32_1 = arith.constant 0 : i32
    return %c0_i32, %c0_i32_0 : i32, i32
  }
  func.func @transform_7(%arg0: i32) -> (i32, i32) {
    %c0_i32 = arith.constant 0 : i32
    %c0_i32_0 = arith.constant 0 : i32
    %c0_i32_1 = arith.constant 0 : i32
    return %c0_i32, %c0_i32_0 : i32, i32
  }
  func.func @transform_8(%arg0: i32) -> (i32, i32) {
    %c0_i32 = arith.constant 0 : i32
    %c0_i32_0 = arith.constant 0 : i32
    %c0_i32_1 = arith.constant 0 : i32
    return %c0_i32, %c0_i32_0 : i32, i32
  }
  func.func @transform_9(%arg0: i32) -> (i32, i32) {
    %c0_i32 = arith.constant 0 : i32
    %c0_i32_0 = arith.constant 0 : i32
    %c0_i32_1 = arith.constant 0 : i32
    return %c0_i32, %c0_i32_0 : i32, i32
  }
  func.func @transform_10(%arg0: i32) -> (i32, i32) {
    %c0_i32 = arith.constant 0 : i32
    %c0_i32_0 = arith.constant 0 : i32
    %c0_i32_1 = arith.constant 0 : i32
    return %c0_i32, %c0_i32_0 : i32, i32
  }
  func.func @transform_11(%arg0: i32) -> (i32, i32) {
    %c0_i32 = arith.constant 0 : i32
    %c0_i32_0 = arith.constant 0 : i32
    return %arg0, %c0_i32 : i32, i32
  }
}

</mosaic_0001>

<bundles_post_ra>
// kernel: lstm_model_forward.1
= control target key start
LH: loop header
LB: loop body
LE: loop exit
PB: predicated region body
PF: predicated region fallthrough
CT: control target
= control target key end

     0   :  { %vm56_vm0 = vcmask 130048   ;;  %v1539_v7 = vmov 0.0   ;;  %s1540_s12 = smov 32   ;;  %s1541_s13 = smov 64   ;;  %vm131_vm5 = vcmask 261120   ;;  %s1942_s2 = inlined_call_operand.vmem [shape: f32[32,128], index: 2, kind: input, shape index: {}]   ;;  %s1943_s1 = inlined_call_operand.vmem [shape: f32[16,128], index: 1, kind: input, shape index: {}]   ;;  %s1944_s0 = inlined_call_operand.vmem [shape: f32[1,64,16], index: 0, kind: input, shape index: {}]   ;;  %s1945_s3 = inlined_call_operand.vmem [shape: f32[1,128], index: 3, kind: input, shape index: {}]   ;;  %s1946_s4 = inlined_call_operand.vmem [shape: f32[32,128], index: 4, kind: input, shape index: {}]   ;;  %s1947_s6 = inlined_call_operand.vmem [shape: f32[1,128], index: 6, kind: input, shape index: {}]   ;;  %s1948_s5 = inlined_call_operand.vmem [shape: f32[32,128], index: 5, kind: input, shape index: {}]   ;;  %s1949_s7 = inlined_call_operand.vmem [shape: f32[32,32], index: 7, kind: input, shape index: {}]   ;;  %s1950_s8 = inlined_call_operand.vmem [shape: f32[1,32], index: 8, kind: input, shape index: {}]   ;;  %s1951_s9 = inlined_call_operand.vmem [shape: f32[32,4], index: 9, kind: input, shape index: {}]   ;;  %s1952_s10 = inlined_call_operand.vmem [shape: f32[1,4], index: 10, kind: input, shape index: {}]   ;;  %s1953_s11 = inlined_call_operand.vmem [shape: f32[8,4], index: 11, kind: output, shape index: {}]  }
   0x1   :  { %v1605_v0 = vld [vmem:[%s1942_s2 + $0x18] sm:$0xff]  ;;  %v39_v1 = vld [vmem:[%s1943_s1 + $0x8] sm:$0xff]  ;;  %v1613_v2 = vld [vmem:[%s1942_s2 + $0x10] sm:$0xff] }
   0x2   :  { %147 = vmatpush.msra.mxu1 %v1605_v0  ;;  %95 = vmatpush.msra.mxu0 %v39_v1  ;;  %v38_v3 = vld [vmem:[%s1943_s1] sm:$0xff]  ;;  %v1625_v5 = vld [vmem:[%s1942_s2 + $0x8] sm:$0xff]  ;;  %v47_v61 = vld [vmem:[%s1944_s0 + $0x10] sm:$0xff] }
   0x3   :  { %v45_v4 = vld [vmem:[%s1944_s0] sm:$0xff]  ;;  %213 = vmatpush.msra.mxu2 %v1605_v0  ;;  %477 = vmatpush.msra.mxu3 %v1605_v0  ;;  %v46_v35 = vld [vmem:[%s1944_s0 + $0x8] sm:$0xff]  ;;  %v48_v62 = vld [vmem:[%s1944_s0 + $0x18] sm:$0xff] }
   0x4   :  { %148 = vmatpush.msra.mxu1 %v1613_v2  ;;  %96 = vmatpush.msra.mxu0 %v38_v3  ;;  %v1634_v6 = vld [vmem:[%s1942_s2] sm:$0xff]  ;;  %v51_v3 = vld [vmem:[%s1944_s0 + $0x30] sm:$0xff] }
   0x5   :  { %1350 = vmatmul.msk.f32.vlgmr.msra.gmra.mxu0 %vm56_vm0, %v45_v4  ;;  %214 = vmatpush.msra.mxu2 %v1613_v2  ;;  %v1664_v8 = vld [vmem:[%s1945_s3] ss:$0 sm:$0xff]  ;;  %v52_v4 = vld [vmem:[%s1944_s0 + $0x38] sm:$0xff] }
   0x6   :  { %149 = vmatpush.msra.mxu1 %v1625_v5  ;;  %279 = vmatpush.msrb.mxu0 %v1605_v0  ;;  %v49_v63 = vld [vmem:[%s1944_s0 + $0x20] sm:$0xff] }
   0x7   :  { %215 = vmatpush.msra.mxu2 %v1625_v5  ;;  %478 = vmatpush.msra.mxu3 %v1613_v2 }
   0x8   :  { %150 = vmatpush.msra.mxu1 %v1634_v6  ;;  %280 = vmatpush.msrb.mxu0 %v1613_v2 }
   0x9   :  { %151 = vmatmul.f32.vlgmr.msra.gmra.mxu1 %v1539_v7  ;;  %216 = vmatpush.msra.mxu2 %v1634_v6 }
   0xa   :  { %281 = vmatpush.msrb.mxu0 %v1625_v5  ;;  %345 = vmatpush.msrb.mxu1 %v1605_v0 }
   0xb   :  { %411 = vmatpush.msrb.mxu2 %v1605_v0  ;;  %479 = vmatpush.msra.mxu3 %v1625_v5 }
   0xc   :  { %282 = vmatpush.msrb.mxu0 %v1634_v6  ;;  %346 = vmatpush.msrb.mxu1 %v1613_v2 }
   0xd   :  { %412 = vmatpush.msrb.mxu2 %v1613_v2  ;;  %480 = vmatpush.msra.mxu3 %v1634_v6 }
   0xe   :  { %347 = vmatpush.msrb.mxu1 %v1625_v5  ;;  %1351 = vmatmul.msk.f32.gmra.mxu0 %vm56_vm0, %v46_v35 }
   0xf   :  { %413 = vmatpush.msrb.mxu2 %v1625_v5 }
  0x10   :  { %348 = vmatpush.msrb.mxu1 %v1634_v6 }
  0x11   :  { %414 = vmatpush.msrb.mxu2 %v1634_v6 }
  0x12   :  { %543 = vmatpush.msra.mxu1 %v1605_v0 }
  0x14   :  { %544 = vmatpush.msra.mxu1 %v1613_v2 }
  0x16   :  { %545 = vmatpush.msra.mxu1 %v1625_v5  ;;  %1352 = vmatmul.msk.f32.gmra.mxu0 %vm56_vm0, %v47_v61 }
  0x18   :  { %546 = vmatpush.msra.mxu1 %v1634_v6 }
  0x1e   :  { %1353 = vmatmul.msk.f32.gmra.mxu0 %vm56_vm0, %v48_v62 }
  0x26   :  { %1354 = vmatmul.msk.f32.gmra.mxu0 %vm56_vm0, %v49_v63 }
  0x82   :  { %v98_v9 = vpop.f32.mrf.mxu0 }
  0x83   :  { %v99_v10 = vadd.f32 %v1664_v8, %v98_v9 }
  0x86   :  { %v152_v11 = vpop.f32.mrf.mxu1 }
  0x87   :  { %v155_v12 = vadd.f32 %v152_v11, %v99_v10 }
  0x89   :  { %1406 = vtanh.f32 %v155_v12  ;;  %v1358_v14 = vmul.f32 -1.442695, %v155_v12 }
  0x8b   :  { %1408 = vpow2.f32 %v1358_v14  ;;  %v101_v37 = vpop.f32.mrf.mxu0 }
  0x8c   :  { %v102_v38 = vadd.f32 %v1664_v8, %v101_v37 }
  0x8f   :  { %v1407_v13 = vpop.eup %1406 }
  0x90   :  { %178 = vrot.lane.b32.xlu0 %v1407_v13, %s1540_s12 }
  0x91   :  { %v1409_v15 = vpop.eup %1408 }
  0x92   :  { %v159_v16 = vadd.f32 1.0, %v1409_v15 }
  0x94   :  { %1410 = vrcp.f32 %v159_v16  ;;  %v171_v22 = vand.u32 2147483648, %v159_v16  ;;  %vm165_vm2 = vweird.f32 %v159_v16  ;;  %v169_v23 = vand.u32 2147483647, %v159_v16 }
  0x96   :  { %v172_v25 = vor.u32 1.1754944e-38, %v171_v22  ;;  %vm170_vm4 = vcmp.eq.f32.partialorder %v169_v23, 8.507059e+37 }
  0x9a   :  { %v1411_v17 = vpop.eup %1410 }
  0x9b   :  { %v161_v18 = vmul.f32 %v1411_v17, %v159_v16  ;;  %vm166_vm1 = vweird.f32 %v1411_v17 }
  0x9c   :  { %vm167_vm3 = vmor %vm165_vm2, %vm166_vm1 }
  0x9d   :  { %v162_v19 = vsub.f32 1.0, %v161_v18 }
  0x9f   :  { %v163_v20 = vmul.f32 %v1411_v17, %v162_v19 }
  0xa1   :  { %v164_v21 = vadd.f32 %v1411_v17, %v163_v20 }
  0xa3   :  { %v168_v24 = vsel %vm167_vm3, %v1411_v17, %v164_v21 }
  0xa4   :  { %v173_v27 = vsel %vm170_vm4, %v172_v25, %v168_v24 }
  0xa5   :  { %v176_v29 = vmul.f32 0.0, %v173_v27 }
 0x102   :  { %v179_v26 = vpop.permute.xlu0 %178 }
 0x103   :  { %v181_v28 = vmul.f32 %v179_v26, %v173_v27 }
 0x105   :  { %183 = vrot.lane.b32.xlu0 %v181_v28, %s1540_s12 }
 0x177   :  { %v184_v30 = vpop.permute.xlu0 %183 }
 0x178   :  { %v186_v31 = vadd.f32 %v184_v30, %v176_v29 }
 0x17a   :  { %1412 = vtanh.f32 %v186_v31 }
 0x180   :  { %v1413_v32 = vpop.eup %1412 }
 0x181   :  { %189 = vrot.lane.b32.xlu1 %v1413_v32, %s1540_s12 }
 0x1f3   :  { %v190_v33 = vpop.permute.xlu1 %189 }
 0x1f4   :  { %v192_v34 = vmul.f32 %v190_v33, %v173_v27 }
 0x1f6   :  { %194 = vrot.lane.b32.xlu1 %v192_v34, %s1541_s13 }
 0x268   :  { %v195_v36 = vpop.permute.xlu1 %194 }
 0x269   :  { %197 = vst.msk [vmem:[#allocation3] sm:$0xff] %vm131_vm5, %v195_v36  ;;  %1359 = vmatmul.msk.f32.vlgmr.msra.gmra.mxu2 %vm131_vm5, %v195_v36 }
 0x26a   :  { %609 = vmatpush.msra.mxu2 %v1605_v0  ;;  %v50_v0 = vld [vmem:[%s1944_s0 + $0x28] sm:$0xff] }
 0x26b   :  { %1355 = vmatmul.msk.f32.gmra.mxu0 %vm56_vm0, %v50_v0 }
 0x26c   :  { %610 = vmatpush.msra.mxu2 %v1613_v2 }
 0x26e   :  { %611 = vmatpush.msra.mxu2 %v1625_v5 }
 0x270   :  { %612 = vmatpush.msra.mxu2 %v1634_v6  ;;  %v104_v6 = vpop.f32.mrf.mxu0 }
 0x271   :  { %v105_v14 = vadd.f32 %v1664_v8, %v104_v6 }
 0x273   :  { %1356 = vmatmul.msk.f32.gmra.mxu0 %vm56_vm0, %v51_v3 }
 0x278   :  { %v107_v9 = vpop.f32.mrf.mxu0 }
 0x27b   :  { %1357 = vmatmul.msk.f32.gmra.mxu0 %vm56_vm0, %v52_v4 }
 0x280   :  { %v1712_v10 = vpop.f32.mrf.mxu0 }
 0x2e8   :  { %v1714_v11 = vpop.f32.mrf.mxu0 }
 0x2ec   :  { %v218_v39 = vpop.f32.mrf.mxu2 }
 0x2ed   :  { %v221_v40 = vadd.f32 %v218_v39, %v102_v38 }
 0x2ef   :  { %1414 = vtanh.f32 %v221_v40  ;;  %v1360_v42 = vmul.f32 -1.442695, %v221_v40  ;;  %v108_v40 = vadd.f32 %v1664_v8, %v107_v9 }
 0x2f0   :  { %v1716_v12 = vpop.f32.mrf.mxu0 }
 0x2f1   :  { %1416 = vpow2.f32 %v1360_v42 }
 0x2f5   :  { %v1415_v41 = vpop.eup %1414 }
 0x2f6   :  { %244 = vrot.lane.b32.xlu2 %v1415_v41, %s1540_s12 }
 0x2f7   :  { %v1417_v43 = vpop.eup %1416 }
 0x2f8   :  { %v225_v44 = vadd.f32 1.0, %v1417_v43  ;;  %v1718_v13 = vpop.f32.mrf.mxu0 }
 0x2fa   :  { %1418 = vrcp.f32 %v225_v44  ;;  %v237_v50 = vand.u32 2147483648, %v225_v44  ;;  %vm231_vm7 = vweird.f32 %v225_v44  ;;  %v235_v51 = vand.u32 2147483647, %v225_v44 }
 0x2fc   :  { %v238_v53 = vor.u32 1.1754944e-38, %v237_v50  ;;  %vm236_vm9 = vcmp.eq.f32.partialorder %v235_v51, 8.507059e+37 }
 0x300   :  { %v1419_v45 = vpop.eup %1418 }
 0x301   :  { %v227_v46 = vmul.f32 %v1419_v45, %v225_v44  ;;  %vm232_vm6 = vweird.f32 %v1419_v45 }
 0x302   :  { %vm233_vm8 = vmor %vm231_vm7, %vm232_vm6 }
 0x303   :  { %v228_v47 = vsub.f32 1.0, %v227_v46 }
 0x305   :  { %v229_v48 = vmul.f32 %v1419_v45, %v228_v47 }
 0x307   :  { %v230_v49 = vadd.f32 %v1419_v45, %v229_v48 }
 0x309   :  { %v234_v52 = vsel %vm233_vm8, %v1419_v45, %v230_v49 }
 0x30a   :  { %v239_v55 = vsel %vm236_vm9, %v238_v53, %v234_v52 }
 0x30b   :  { %v242_v57 = vmul.f32 %v239_v55, %v186_v31 }
 0x350   :  { %v245_v54 = vpop.permute.xlu2 %244 }
 0x351   :  { %v247_v56 = vmul.f32 %v245_v54, %v239_v55 }
 0x353   :  { %249 = vrot.lane.b32.xlu2 %v247_v56, %s1540_s12 }
 0x3ad   :  { %v250_v58 = vpop.permute.xlu2 %249 }
 0x3ae   :  { %v252_v59 = vadd.f32 %v250_v58, %v242_v57 }
 0x3b0   :  { %1420 = vtanh.f32 %v252_v59 }
 0x3b6   :  { %v1421_v60 = vpop.eup %1420 }
 0x3b7   :  { %255 = vrot.lane.b32.xlu0 %v1421_v60, %s1540_s12 }
 0x429   :  { %v256_v1 = vpop.permute.xlu0 %255 }
 0x42a   :  { %v258_v2 = vmul.f32 %v256_v1, %v239_v55 }
 0x42c   :  { %260 = vrot.lane.b32.xlu1 %v258_v2, %s1541_s13  ;;  %v111_v2 = vadd.f32 %v1664_v8, %v1712_v10 }
 0x49e   :  { %v261_v5 = vpop.permute.xlu1 %260 }
 0x49f   :  { %263 = vst.msk [vmem:[#allocation3 + $0x8] sm:$0xff] %vm131_vm5, %v261_v5  ;;  %1361 = vmatmul.msk.f32.vlgmr.msrb.gmra.mxu0 %vm131_vm5, %v261_v5 }
 0x51c   :  { %v284_v15 = vpop.f32.mrf.mxu0 }
 0x51d   :  { %v287_v16 = vadd.f32 %v284_v15, %v105_v14 }
 0x51f   :  { %1422 = vtanh.f32 %v287_v16  ;;  %v1362_v18 = vmul.f32 -1.442695, %v287_v16 }
 0x521   :  { %1424 = vpow2.f32 %v1362_v18 }
 0x525   :  { %v1423_v17 = vpop.eup %1422 }
 0x526   :  { %310 = vrot.lane.b32.xlu2 %v1423_v17, %s1540_s12 }
 0x527   :  { %v1425_v19 = vpop.eup %1424 }
 0x528   :  { %v291_v20 = vadd.f32 1.0, %v1425_v19 }
 0x52a   :  { %1426 = vrcp.f32 %v291_v20  ;;  %v303_v26 = vand.u32 2147483648, %v291_v20  ;;  %vm297_vm11 = vweird.f32 %v291_v20  ;;  %v301_v27 = vand.u32 2147483647, %v291_v20 }
 0x52c   :  { %v304_v29 = vor.u32 1.1754944e-38, %v303_v26  ;;  %vm302_vm13 = vcmp.eq.f32.partialorder %v301_v27, 8.507059e+37 }
 0x530   :  { %v1427_v21 = vpop.eup %1426 }
 0x531   :  { %v293_v22 = vmul.f32 %v1427_v21, %v291_v20  ;;  %vm298_vm10 = vweird.f32 %v1427_v21 }
 0x532   :  { %vm299_vm12 = vmor %vm297_vm11, %vm298_vm10 }
 0x533   :  { %v294_v23 = vsub.f32 1.0, %v293_v22 }
 0x535   :  { %v295_v24 = vmul.f32 %v1427_v21, %v294_v23 }
 0x537   :  { %v296_v25 = vadd.f32 %v1427_v21, %v295_v24 }
 0x539   :  { %v300_v28 = vsel %vm299_vm12, %v1427_v21, %v296_v25 }
 0x53a   :  { %v305_v31 = vsel %vm302_vm13, %v304_v29, %v300_v28 }
 0x53b   :  { %v308_v33 = vmul.f32 %v305_v31, %v252_v59 }
 0x580   :  { %v311_v30 = vpop.permute.xlu2 %310 }
 0x581   :  { %v313_v32 = vmul.f32 %v311_v30, %v305_v31 }
 0x583   :  { %315 = vrot.lane.b32.xlu0 %v313_v32, %s1540_s12  ;;  %v663_v32 = vld [vmem:[%s1946_s4 + $0x18] sm:$0xff] }
 0x584   :  { %716 = vmatpush.msrb.mxu3 %v663_v32 }
 0x5f5   :  { %v316_v34 = vpop.permute.xlu0 %315 }
 0x5f6   :  { %v318_v35 = vadd.f32 %v316_v34, %v308_v33  ;;  %v662_v33 = vld [vmem:[%s1946_s4 + $0x10] sm:$0xff]  ;;  %v661_v34 = vld [vmem:[%s1946_s4 + $0x8] sm:$0xff] }
 0x5f7   :  { %717 = vmatpush.msrb.mxu3 %v662_v33 }
 0x5f8   :  { %1428 = vtanh.f32 %v318_v35 }
 0x5f9   :  { %718 = vmatpush.msrb.mxu3 %v661_v34 }
 0x5fe   :  { %v1429_v36 = vpop.eup %1428 }
 0x5ff   :  { %321 = vrot.lane.b32.xlu1 %v1429_v36, %s1540_s12 }
 0x671   :  { %v322_v37 = vpop.permute.xlu1 %321 }
 0x672   :  { %v324_v38 = vmul.f32 %v322_v37, %v305_v31  ;;  %v669_v37 = vld [vmem:[#allocation3] sm:$0xff] }
 0x674   :  { %326 = vrot.lane.b32.xlu2 %v324_v38, %s1541_s13  ;;  %v670_v38 = vld [vmem:[#allocation3 + $0x8] sm:$0xff] }
 0x6ce   :  { %v327_v39 = vpop.permute.xlu2 %326 }
 0x6cf   :  { %329 = vst.msk [vmem:[#allocation3 + $0x10] sm:$0xff] %vm131_vm5, %v327_v39  ;;  %1363 = vmatmul.msk.f32.vlgmr.msrb.gmra.mxu1 %vm131_vm5, %v327_v39 }
 0x6d6   :  { %v671_v39 = vld [vmem:[#allocation3 + $0x10] sm:$0xff] }
 0x74c   :  { %v350_v41 = vpop.f32.mrf.mxu1 }
 0x74d   :  { %v353_v42 = vadd.f32 %v350_v41, %v108_v40 }
 0x74f   :  { %1430 = vtanh.f32 %v353_v42  ;;  %v1364_v44 = vmul.f32 -1.442695, %v353_v42  ;;  %v114_v42 = vadd.f32 %v1664_v8, %v1714_v11 }
 0x751   :  { %1432 = vpow2.f32 %v1364_v44 }
 0x755   :  { %v1431_v43 = vpop.eup %1430 }
 0x756   :  { %376 = vrot.lane.b32.xlu0 %v1431_v43, %s1540_s12 }
 0x757   :  { %v1433_v45 = vpop.eup %1432 }
 0x758   :  { %v357_v46 = vadd.f32 1.0, %v1433_v45 }
 0x75a   :  { %1434 = vrcp.f32 %v357_v46  ;;  %v369_v52 = vand.u32 2147483648, %v357_v46  ;;  %vm363_vm15 = vweird.f32 %v357_v46  ;;  %v367_v53 = vand.u32 2147483647, %v357_v46 }
 0x75c   :  { %v370_v55 = vor.u32 1.1754944e-38, %v369_v52  ;;  %vm368_vm1 = vcmp.eq.f32.partialorder %v367_v53, 8.507059e+37 }
 0x760   :  { %v1435_v47 = vpop.eup %1434 }
 0x761   :  { %v359_v48 = vmul.f32 %v1435_v47, %v357_v46  ;;  %vm364_vm14 = vweird.f32 %v1435_v47 }
 0x762   :  { %vm365_vm0 = vmor %vm363_vm15, %vm364_vm14 }
 0x763   :  { %v360_v49 = vsub.f32 1.0, %v359_v48 }
 0x765   :  { %v361_v50 = vmul.f32 %v1435_v47, %v360_v49 }
 0x767   :  { %v362_v51 = vadd.f32 %v1435_v47, %v361_v50 }
 0x769   :  { %v366_v54 = vsel %vm365_vm0, %v1435_v47, %v362_v51 }
 0x76a   :  { %v371_v57 = vsel %vm368_vm1, %v370_v55, %v366_v54 }
 0x76b   :  { %v374_v59 = vmul.f32 %v371_v57, %v318_v35  ;;  %v660_v35 = vld [vmem:[%s1946_s4] sm:$0xff] }
 0x76c   :  { %719 = vmatpush.msrb.mxu3 %v660_v35 }
 0x7c8   :  { %v377_v56 = vpop.permute.xlu0 %376 }
 0x7c9   :  { %v379_v58 = vmul.f32 %v377_v56, %v371_v57 }
 0x7cb   :  { %381 = vrot.lane.b32.xlu1 %v379_v58, %s1540_s12 }
 0x83d   :  { %v382_v60 = vpop.permute.xlu1 %381 }
 0x83e   :  { %v384_v61 = vadd.f32 %v382_v60, %v374_v59 }
 0x840   :  { %1436 = vtanh.f32 %v384_v61 }
 0x846   :  { %v1437_v62 = vpop.eup %1436 }
 0x847   :  { %387 = vrot.lane.b32.xlu2 %v1437_v62, %s1540_s12 }
 0x8a1   :  { %v388_v63 = vpop.permute.xlu2 %387 }
 0x8a2   :  { %v390_v0 = vmul.f32 %v388_v63, %v371_v57 }
 0x8a4   :  { %392 = vrot.lane.b32.xlu0 %v390_v0, %s1541_s13 }
 0x916   :  { %v393_v1 = vpop.permute.xlu0 %392 }
 0x917   :  { %395 = vst.msk [vmem:[#allocation3 + $0x18] sm:$0xff] %vm131_vm5, %v393_v1  ;;  %1365 = vmatmul.msk.f32.vlgmr.msrb.gmra.mxu2 %vm131_vm5, %v393_v1 }
 0x91e   :  { %v672_v40 = vld [vmem:[#allocation3 + $0x18] sm:$0xff] }
 0x99a   :  { %v416_v3 = vpop.f32.mrf.mxu2 }
 0x99b   :  { %v419_v4 = vadd.f32 %v416_v3, %v111_v2  ;;  %v1771_v2 = vld [vmem:[%s1948_s5 + $0x18] sm:$0xff]  ;;  %v1776_v3 = vld [vmem:[%s1948_s5 + $0x10] sm:$0xff] }
 0x99c   :  { %766 = vmatpush.msrb.mxu1 %v1771_v2  ;;  %830 = vmatpush.msrb.mxu2 %v1771_v2 }
 0x99d   :  { %1438 = vtanh.f32 %v419_v4  ;;  %v1366_v6 = vmul.f32 -1.442695, %v419_v4  ;;  %v1783_v4 = vld [vmem:[%s1948_s5 + $0x8] sm:$0xff] }
 0x99e   :  { %767 = vmatpush.msrb.mxu1 %v1776_v3  ;;  %831 = vmatpush.msrb.mxu2 %v1776_v3 }
 0x99f   :  { %1440 = vpow2.f32 %v1366_v6 }
 0x9a0   :  { %768 = vmatpush.msrb.mxu1 %v1783_v4  ;;  %832 = vmatpush.msrb.mxu2 %v1783_v4 }
 0x9a3   :  { %v1439_v5 = vpop.eup %1438 }
 0x9a4   :  { %442 = vrot.lane.b32.xlu1 %v1439_v5, %s1540_s12  ;;  %v1790_v5 = vld [vmem:[%s1948_s5] sm:$0xff] }
 0x9a5   :  { %v1441_v9 = vpop.eup %1440  ;;  %769 = vmatpush.msrb.mxu1 %v1790_v5  ;;  %833 = vmatpush.msrb.mxu2 %v1790_v5 }
 0x9a6   :  { %v423_v14 = vadd.f32 1.0, %v1441_v9 }
 0x9a8   :  { %1442 = vrcp.f32 %v423_v14  ;;  %v435_v20 = vand.u32 2147483648, %v423_v14  ;;  %vm429_vm3 = vweird.f32 %v423_v14  ;;  %v433_v10 = vand.u32 2147483647, %v423_v14 }
 0x9aa   :  { %v436_v22 = vor.u32 1.1754944e-38, %v435_v20  ;;  %vm434_vm6 = vcmp.eq.f32.partialorder %v433_v10, 8.507059e+37 }
 0x9ae   :  { %v1443_v15 = vpop.eup %1442 }
 0x9af   :  { %v425_v16 = vmul.f32 %v1443_v15, %v423_v14  ;;  %vm430_vm2 = vweird.f32 %v1443_v15  ;;  %v117_v14 = vadd.f32 %v1664_v8, %v1716_v12 }
 0x9b0   :  { %vm431_vm4 = vmor %vm429_vm3, %vm430_vm2 }
 0x9b1   :  { %v426_v17 = vsub.f32 1.0, %v425_v16 }
 0x9b3   :  { %v427_v18 = vmul.f32 %v1443_v15, %v426_v17  ;;  %v1813_v17 = vld [vmem:[%s1947_s6] ss:$0 sm:$0xff] }
 0x9b5   :  { %v428_v19 = vadd.f32 %v1443_v15, %v427_v18 }
 0x9b7   :  { %v432_v21 = vsel %vm431_vm4, %v1443_v15, %v428_v19 }
 0x9b8   :  { %v437_v24 = vsel %vm434_vm6, %v436_v22, %v432_v21 }
 0x9b9   :  { %v440_v26 = vmul.f32 %v437_v24, %v384_v61 }
 0xa16   :  { %v443_v23 = vpop.permute.xlu1 %442 }
 0xa17   :  { %v445_v25 = vmul.f32 %v443_v23, %v437_v24 }
 0xa19   :  { %447 = vrot.lane.b32.xlu2 %v445_v25, %s1540_s12 }
 0xa73   :  { %v448_v27 = vpop.permute.xlu2 %447 }
 0xa74   :  { %v450_v28 = vadd.f32 %v448_v27, %v440_v26 }
 0xa76   :  { %1444 = vtanh.f32 %v450_v28 }
 0xa7c   :  { %v1445_v29 = vpop.eup %1444 }
 0xa7d   :  { %453 = vrot.lane.b32.xlu0 %v1445_v29, %s1540_s12 }
 0xaef   :  { %v454_v30 = vpop.permute.xlu0 %453 }
 0xaf0   :  { %v456_v31 = vmul.f32 %v454_v30, %v437_v24 }
 0xaf2   :  { %458 = vrot.lane.b32.xlu1 %v456_v31, %s1541_s13 }
 0xb64   :  { %v459_v36 = vpop.permute.xlu1 %458 }
 0xb65   :  { %461 = vst.msk [vmem:[#allocation3 + $0x20] sm:$0xff] %vm131_vm5, %v459_v36  ;;  %1367 = vmatmul.msk.f32.vlgmr.msra.gmra.mxu3 %vm131_vm5, %v459_v36 }
 0xb6c   :  { %v673_v41 = vld [vmem:[#allocation3 + $0x20] sm:$0xff] }
 0xb6d   :  { %1373 = vmatmul.msk.f32.vlgmr.msrb.gmra.mxu3 %vm131_vm5, %v669_v37 }
 0xb75   :  { %1374 = vmatmul.msk.f32.gmra.mxu3 %vm131_vm5, %v670_v38 }
 0xb7d   :  { %1375 = vmatmul.msk.f32.gmra.mxu3 %vm131_vm5, %v671_v39 }
 0xb85   :  { %1376 = vmatmul.msk.f32.gmra.mxu3 %vm131_vm5, %v672_v40 }
 0xb8d   :  { %1377 = vmatmul.msk.f32.gmra.mxu3 %vm131_vm5, %v673_v41 }
 0xbe8   :  { %v482_v43 = vpop.f32.mrf.mxu3 }
 0xbe9   :  { %v485_v44 = vadd.f32 %v482_v43, %v114_v42 }
 0xbeb   :  { %1446 = vtanh.f32 %v485_v44  ;;  %v1368_v46 = vmul.f32 -1.442695, %v485_v44 }
 0xbed   :  { %1448 = vpow2.f32 %v1368_v46 }
 0xbf1   :  { %v1447_v45 = vpop.eup %1446 }
 0xbf2   :  { %508 = vrot.lane.b32.xlu2 %v1447_v45, %s1540_s12 }
 0xbf3   :  { %v1449_v47 = vpop.eup %1448 }
 0xbf4   :  { %v489_v48 = vadd.f32 1.0, %v1449_v47 }
 0xbf6   :  { %1450 = vrcp.f32 %v489_v48  ;;  %v501_v54 = vand.u32 2147483648, %v489_v48  ;;  %vm495_vm8 = vweird.f32 %v489_v48  ;;  %v499_v11 = vand.u32 2147483647, %v489_v48 }
 0xbf8   :  { %v502_v56 = vor.u32 1.1754944e-38, %v501_v54  ;;  %vm500_vm10 = vcmp.eq.f32.partialorder %v499_v11, 8.507059e+37 }
 0xbfc   :  { %v1451_v49 = vpop.eup %1450 }
 0xbfd   :  { %v491_v50 = vmul.f32 %v1451_v49, %v489_v48  ;;  %vm496_vm7 = vweird.f32 %v1451_v49 }
 0xbfe   :  { %vm497_vm9 = vmor %vm495_vm8, %vm496_vm7 }
 0xbff   :  { %v492_v51 = vsub.f32 1.0, %v491_v50 }
 0xc01   :  { %v493_v52 = vmul.f32 %v1451_v49, %v492_v51 }
 0xc03   :  { %v494_v53 = vadd.f32 %v1451_v49, %v493_v52 }
 0xc05   :  { %v498_v55 = vsel %vm497_vm9, %v1451_v49, %v494_v53 }
 0xc06   :  { %v503_v58 = vsel %vm500_vm10, %v502_v56, %v498_v55 }
 0xc07   :  { %v506_v60 = vmul.f32 %v503_v58, %v450_v28 }
 0xc4c   :  { %v509_v57 = vpop.permute.xlu2 %508 }
 0xc4d   :  { %v511_v59 = vmul.f32 %v509_v57, %v503_v58 }
 0xc4f   :  { %513 = vrot.lane.b32.xlu0 %v511_v59, %s1540_s12 }
 0xcc1   :  { %v514_v61 = vpop.permute.xlu0 %513 }
 0xcc2   :  { %v1763_v62 = vadd.f32 %v514_v61, %v506_v60 }
 0xcc4   :  { %1452 = vtanh.f32 %v1763_v62 }
 0xcca   :  { %v1453_v63 = vpop.eup %1452 }
 0xccb   :  { %519 = vrot.lane.b32.xlu1 %v1453_v63, %s1540_s12 }
 0xd3d   :  { %v520_v0 = vpop.permute.xlu1 %519 }
 0xd3e   :  { %v522_v1 = vmul.f32 %v520_v0, %v503_v58 }
 0xd40   :  { %524 = vrot.lane.b32.xlu2 %v522_v1, %s1541_s13 }
 0xd9a   :  { %v525_v6 = vpop.permute.xlu2 %524 }
 0xd9b   :  { %527 = vst.msk [vmem:[#allocation3 + $0x28] sm:$0xff] %vm131_vm5, %v525_v6  ;;  %1369 = vmatmul.msk.f32.vlgmr.msra.gmra.mxu1 %vm131_vm5, %v525_v6 }
 0xd9c   :  { %894 = vmatpush.msra.mxu1 %v1771_v2 }
 0xd9e   :  { %895 = vmatpush.msra.mxu1 %v1776_v3 }
 0xda0   :  { %896 = vmatpush.msra.mxu1 %v1783_v4 }
 0xda2   :  { %v674_v9 = vld [vmem:[#allocation3 + $0x28] sm:$0xff]  ;;  %897 = vmatpush.msra.mxu1 %v1790_v5 }
 0xda3   :  { %1378 = vmatmul.msk.f32.gmra.mxu3 %vm131_vm5, %v674_v9  ;;  %770 = vmatmul.f32.vlgmr.msrb.gmra.mxu1 %v1539_v7  ;;  %v721_v7 = vpop.f32.mrf.mxu3 }
 0xda4   :  { %1022 = vmatpush.msrb.mxu1 %v1771_v2  ;;  %v722_v18 = vadd.f32 %v1813_v17, %v721_v7 }
 0xda6   :  { %1023 = vmatpush.msrb.mxu1 %v1776_v3 }
 0xda8   :  { %1024 = vmatpush.msrb.mxu1 %v1783_v4 }
 0xdaa   :  { %1025 = vmatpush.msrb.mxu1 %v1790_v5 }
 0xdab   :  { %v724_v1 = vpop.f32.mrf.mxu3 }
 0xdac   :  { %v725_v6 = vadd.f32 %v1813_v17, %v724_v1 }
 0xe18   :  { %v548_v15 = vpop.f32.mrf.mxu1 }
 0xe19   :  { %v551_v16 = vadd.f32 %v548_v15, %v117_v14 }
 0xe1b   :  { %1454 = vtanh.f32 %v551_v16  ;;  %v1370_v8 = vmul.f32 -1.442695, %v551_v16 }
 0xe20   :  { %v771_v19 = vpop.f32.mrf.mxu1 }
 0xe21   :  { %v1455_v20 = vpop.eup %1454  ;;  %v774_v10 = vadd.f32 %v771_v19, %v722_v18 }
 0xe22   :  { %574 = vrot.lane.b32.xlu0 %v1455_v20, %s1540_s12 }
 0xe23   :  { %1456 = vtanh.f32 %v774_v10  ;;  %v1381_v12 = vmul.f32 -1.442695, %v774_v10 }
 0xe24   :  { %1458 = vpow2.f32 %v1370_v8 }
 0xe25   :  { %1460 = vpow2.f32 %v1381_v12 }
 0xe29   :  { %v1457_v21 = vpop.eup %1456 }
 0xe2a   :  { %797 = vrot.lane.b32.xlu1 %v1457_v21, %s1540_s12  ;;  %v1459_v22 = vpop.eup %1458 }
 0xe2b   :  { %v555_v23 = vadd.f32 1.0, %v1459_v22  ;;  %v1461_v24 = vpop.eup %1460 }
 0xe2c   :  { %v778_v25 = vadd.f32 1.0, %v1461_v24 }
 0xe2d   :  { %1462 = vrcp.f32 %v555_v23  ;;  %v567_v34 = vand.u32 2147483648, %v555_v23  ;;  %vm561_vm12 = vweird.f32 %v555_v23  ;;  %v565_v35 = vand.u32 2147483647, %v555_v23 }
 0xe2e   :  { %1464 = vrcp.f32 %v778_v25  ;;  %v790_v43 = vand.u32 2147483648, %v778_v25  ;;  %vm784_vm0 = vweird.f32 %v778_v25  ;;  %v788_v44 = vand.u32 2147483647, %v778_v25 }
 0xe2f   :  { %v568_v38 = vor.u32 1.1754944e-38, %v567_v34  ;;  %vm566_vm14 = vcmp.eq.f32.partialorder %v565_v35, 8.507059e+37  ;;  %v727_v35 = vpop.f32.mrf.mxu3 }
 0xe30   :  { %v791_v46 = vor.u32 1.1754944e-38, %v790_v43  ;;  %vm789_vm2 = vcmp.eq.f32.partialorder %v788_v44, 8.507059e+37 }
 0xe33   :  { %v1463_v26 = vpop.eup %1462 }
 0xe34   :  { %v557_v27 = vmul.f32 %v1463_v26, %v555_v23  ;;  %v1465_v29 = vpop.eup %1464  ;;  %vm562_vm11 = vweird.f32 %v1463_v26 }
 0xe35   :  { %v780_v31 = vmul.f32 %v1465_v29, %v778_v25  ;;  %vm563_vm13 = vmor %vm561_vm12, %vm562_vm11  ;;  %vm785_vm15 = vweird.f32 %v1465_v29 }
 0xe36   :  { %v558_v28 = vsub.f32 1.0, %v557_v27  ;;  %vm786_vm1 = vmor %vm784_vm0, %vm785_vm15 }
 0xe37   :  { %v781_v33 = vsub.f32 1.0, %v780_v31 }
 0xe38   :  { %v559_v30 = vmul.f32 %v1463_v26, %v558_v28 }
 0xe39   :  { %v782_v37 = vmul.f32 %v1465_v29, %v781_v33 }
 0xe3a   :  { %v560_v32 = vadd.f32 %v1463_v26, %v559_v30 }
 0xe3b   :  { %v783_v42 = vadd.f32 %v1465_v29, %v782_v37 }
 0xe3c   :  { %v564_v36 = vsel %vm563_vm13, %v1463_v26, %v560_v32 }
 0xe3d   :  { %v569_v40 = vsel %vm566_vm14, %v568_v38, %v564_v36  ;;  %v787_v45 = vsel %vm786_vm1, %v1465_v29, %v783_v42  ;;  %v728_v36 = vadd.f32 %v1813_v17, %v727_v35 }
 0xe3e   :  { %v792_v48 = vsel %vm789_vm2, %v791_v46, %v787_v45  ;;  %v572_v50 = vmul.f32 %v569_v40, %v1763_v62 }
 0xe3f   :  { %v795_v54 = vmul.f32 0.0, %v792_v48 }
 0xe94   :  { %v575_v39 = vpop.permute.xlu0 %574 }
 0xe95   :  { %v577_v41 = vmul.f32 %v575_v39, %v569_v40 }
 0xe97   :  { %579 = vrot.lane.b32.xlu2 %v577_v41, %s1540_s12 }
 0xe9c   :  { %v798_v47 = vpop.permute.xlu1 %797 }
 0xe9d   :  { %v800_v49 = vmul.f32 %v798_v47, %v792_v48 }
 0xe9f   :  { %802 = vrot.lane.b32.xlu0 %v800_v49, %s1540_s12 }
 0xef1   :  { %v580_v51 = vpop.permute.xlu2 %579 }
 0xef2   :  { %v1821_v52 = vadd.f32 %v580_v51, %v572_v50 }
 0xef4   :  { %1466 = vtanh.f32 %v1821_v52 }
 0xefa   :  { %v1467_v53 = vpop.eup %1466 }
 0xefb   :  { %585 = vrot.lane.b32.xlu1 %v1467_v53, %s1540_s12 }
 0xf11   :  { %v803_v11 = vpop.permute.xlu0 %802 }
 0xf12   :  { %v805_v55 = vadd.f32 %v803_v11, %v795_v54 }
 0xf14   :  { %1468 = vtanh.f32 %v805_v55 }
 0xf1a   :  { %v1469_v56 = vpop.eup %1468 }
 0xf1b   :  { %808 = vrot.lane.b32.xlu2 %v1469_v56, %s1540_s12 }
 0xf6d   :  { %v586_v57 = vpop.permute.xlu1 %585 }
 0xf6e   :  { %v588_v58 = vmul.f32 %v586_v57, %v569_v40 }
 0xf70   :  { %590 = vrot.lane.b32.xlu0 %v588_v58, %s1541_s13 }
 0xf75   :  { %v809_v59 = vpop.permute.xlu2 %808 }
 0xf76   :  { %v811_v60 = vmul.f32 %v809_v59, %v792_v48 }
 0xf78   :  { %814 = vrot.lane.b32.xlu1 %v811_v60, %s1541_s13 }
 0xfe2   :  { %v591_v61 = vpop.permute.xlu0 %590 }
 0xfe3   :  { %593 = vst.msk [vmem:[#allocation3 + $0x30] sm:$0xff] %vm131_vm5, %v591_v61  ;;  %1371 = vmatmul.msk.f32.vlgmr.msra.gmra.mxu2 %vm131_vm5, %v591_v61 }
 0xfe4   :  { %958 = vmatpush.msra.mxu2 %v1771_v2 }
 0xfe6   :  { %959 = vmatpush.msra.mxu2 %v1776_v3 }
 0xfe8   :  { %960 = vmatpush.msra.mxu2 %v1783_v4 }
 0xfea   :  { %v815_v62 = vpop.permute.xlu1 %814  ;;  %v675_v63 = vld [vmem:[#allocation3 + $0x30] sm:$0xff]  ;;  %961 = vmatpush.msra.mxu2 %v1790_v5 }
 0xfeb   :  { %1379 = vmatmul.msk.f32.gmra.mxu3 %vm131_vm5, %v675_v63  ;;  %1382 = vmatmul.msk.f32.vlgmr.msrb.gmra.mxu2 %vm131_vm5, %v815_v62  ;;  %v730_v62 = vpop.f32.mrf.mxu3 }
 0xfec   :  { %1086 = vmatpush.msrb.mxu2 %v1771_v2  ;;  %v731_v63 = vadd.f32 %v1813_v17, %v730_v62 }
 0xfee   :  { %1087 = vmatpush.msrb.mxu2 %v1776_v3 }
 0xff0   :  { %1088 = vmatpush.msrb.mxu2 %v1783_v4 }
 0xff2   :  { %1089 = vmatpush.msrb.mxu2 %v1790_v5 }
0x1066   :  { %v1840_v0 = vpop.f32.mrf.mxu2 }
0x106e   :  { %v835_v9 = vpop.f32.mrf.mxu2 }
0x106f   :  { %v838_v14 = vadd.f32 %v835_v9, %v725_v6 }
0x1071   :  { %1470 = vtanh.f32 %v838_v14  ;;  %v1383_v16 = vmul.f32 -1.442695, %v838_v14 }
0x1073   :  { %1472 = vpow2.f32 %v1383_v16 }
0x1077   :  { %v1471_v15 = vpop.eup %1470 }
0x1078   :  { %861 = vrot.lane.b32.xlu2 %v1471_v15, %s1540_s12 }
0x1079   :  { %v1473_v7 = vpop.eup %1472 }
0x107a   :  { %v842_v18 = vadd.f32 1.0, %v1473_v7 }
0x107c   :  { %1474 = vrcp.f32 %v842_v18  ;;  %v854_v12 = vand.u32 2147483648, %v842_v18  ;;  %vm848_vm4 = vweird.f32 %v842_v18  ;;  %v852_v22 = vand.u32 2147483647, %v842_v18 }
0x107e   :  { %v855_v24 = vor.u32 1.1754944e-38, %v854_v12  ;;  %vm853_vm7 = vcmp.eq.f32.partialorder %v852_v22, 8.507059e+37 }
0x1082   :  { %v1475_v19 = vpop.eup %1474 }
0x1083   :  { %v844_v20 = vmul.f32 %v1475_v19, %v842_v18  ;;  %vm849_vm3 = vweird.f32 %v1475_v19 }
0x1084   :  { %vm850_vm6 = vmor %vm848_vm4, %vm849_vm3 }
0x1085   :  { %v845_v10 = vsub.f32 1.0, %v844_v20 }
0x1087   :  { %v846_v21 = vmul.f32 %v1475_v19, %v845_v10 }
0x1089   :  { %v847_v8 = vadd.f32 %v1475_v19, %v846_v21 }
0x108b   :  { %v851_v23 = vsel %vm850_vm6, %v1475_v19, %v847_v8 }
0x108c   :  { %v856_v26 = vsel %vm853_vm7, %v855_v24, %v851_v23 }
0x108d   :  { %v859_v28 = vmul.f32 %v856_v26, %v805_v55 }
0x10d2   :  { %v862_v25 = vpop.permute.xlu2 %861 }
0x10d3   :  { %v864_v27 = vmul.f32 %v862_v25, %v856_v26 }
0x10d5   :  { %866 = vrot.lane.b32.xlu0 %v864_v27, %s1540_s12 }
0x1147   :  { %v867_v29 = vpop.permute.xlu0 %866 }
0x1148   :  { %v869_v30 = vadd.f32 %v867_v29, %v859_v28  ;;  %v733_v29 = vpop.f32.mrf.mxu3 }
0x114a   :  { %1476 = vtanh.f32 %v869_v30 }
0x1150   :  { %v1477_v31 = vpop.eup %1476 }
0x1151   :  { %872 = vrot.lane.b32.xlu1 %v1477_v31, %s1540_s12 }
0x11c3   :  { %v873_v32 = vpop.permute.xlu1 %872 }
0x11c4   :  { %v875_v33 = vmul.f32 %v873_v32, %v856_v26 }
0x11c6   :  { %878 = vrot.lane.b32.xlu2 %v875_v33, %s1541_s13 }
0x1220   :  { %v879_v34 = vpop.permute.xlu2 %878 }
0x1221   :  { %1384 = vmatmul.msk.f32.vlgmr.msra.gmra.mxu1 %vm131_vm5, %v879_v34 }
0x1222   :  { %1150 = vmatpush.msra.mxu1 %v1771_v2 }
0x1224   :  { %1151 = vmatpush.msra.mxu1 %v1776_v3 }
0x1226   :  { %1152 = vmatpush.msra.mxu1 %v1783_v4 }
0x1228   :  { %1153 = vmatpush.msra.mxu1 %v1790_v5 }
0x129e   :  { %v899_v37 = vpop.f32.mrf.mxu1 }
0x129f   :  { %v902_v38 = vadd.f32 %v899_v37, %v728_v36 }
0x12a1   :  { %1478 = vtanh.f32 %v902_v38  ;;  %v1385_v40 = vmul.f32 -1.442695, %v902_v38 }
0x12a3   :  { %1480 = vpow2.f32 %v1385_v40 }
0x12a7   :  { %v1479_v39 = vpop.eup %1478 }
0x12a8   :  { %925 = vrot.lane.b32.xlu0 %v1479_v39, %s1540_s12 }
0x12a9   :  { %v1481_v41 = vpop.eup %1480 }
0x12aa   :  { %v906_v42 = vadd.f32 1.0, %v1481_v41 }
0x12ac   :  { %1482 = vrcp.f32 %v906_v42  ;;  %v918_v48 = vand.u32 2147483648, %v906_v42  ;;  %vm912_vm9 = vweird.f32 %v906_v42  ;;  %v916_v49 = vand.u32 2147483647, %v906_v42 }
0x12ae   :  { %v919_v51 = vor.u32 1.1754944e-38, %v918_v48  ;;  %vm917_vm11 = vcmp.eq.f32.partialorder %v916_v49, 8.507059e+37 }
0x12b2   :  { %v1483_v43 = vpop.eup %1482 }
0x12b3   :  { %v908_v44 = vmul.f32 %v1483_v43, %v906_v42  ;;  %vm913_vm8 = vweird.f32 %v1483_v43 }
0x12b4   :  { %vm914_vm10 = vmor %vm912_vm9, %vm913_vm8 }
0x12b5   :  { %v909_v45 = vsub.f32 1.0, %v908_v44 }
0x12b7   :  { %v910_v46 = vmul.f32 %v1483_v43, %v909_v45 }
0x12b9   :  { %v911_v47 = vadd.f32 %v1483_v43, %v910_v46 }
0x12bb   :  { %v915_v50 = vsel %vm914_vm10, %v1483_v43, %v911_v47 }
0x12bc   :  { %v920_v54 = vsel %vm917_vm11, %v919_v51, %v915_v50 }
0x12bd   :  { %v923_v55 = vmul.f32 %v920_v54, %v869_v30  ;;  %v734_v30 = vadd.f32 %v1813_v17, %v733_v29 }
0x131a   :  { %v926_v53 = vpop.permute.xlu0 %925 }
0x131b   :  { %v928_v11 = vmul.f32 %v926_v53, %v920_v54 }
0x131d   :  { %930 = vrot.lane.b32.xlu1 %v928_v11, %s1540_s12 }
0x138f   :  { %v931_v56 = vpop.permute.xlu1 %930 }
0x1390   :  { %v933_v57 = vadd.f32 %v931_v56, %v923_v55  ;;  %v736_v56 = vpop.f32.mrf.mxu3 }
0x1392   :  { %1484 = vtanh.f32 %v933_v57 }
0x1398   :  { %v1485_v58 = vpop.eup %1484 }
0x1399   :  { %936 = vrot.lane.b32.xlu2 %v1485_v58, %s1540_s12 }
0x13f3   :  { %v937_v59 = vpop.permute.xlu2 %936 }
0x13f4   :  { %v939_v60 = vmul.f32 %v937_v59, %v920_v54 }
0x13f6   :  { %942 = vrot.lane.b32.xlu0 %v939_v60, %s1541_s13 }
0x1468   :  { %v943_v61 = vpop.permute.xlu0 %942 }
0x1469   :  { %1386 = vmatmul.msk.f32.vlgmr.msra.gmra.mxu2 %vm131_vm5, %v943_v61 }
0x146a   :  { %1214 = vmatpush.msra.mxu2 %v1771_v2 }
0x146c   :  { %1215 = vmatpush.msra.mxu2 %v1776_v3 }
0x146e   :  { %1216 = vmatpush.msra.mxu2 %v1783_v4 }
0x1470   :  { %1217 = vmatpush.msra.mxu2 %v1790_v5 }
0x14ec   :  { %v963_v1 = vpop.f32.mrf.mxu2 }
0x14ed   :  { %v966_v6 = vadd.f32 %v963_v1, %v731_v63 }
0x14ef   :  { %1486 = vtanh.f32 %v966_v6  ;;  %v1387_v14 = vmul.f32 -1.442695, %v966_v6 }
0x14f1   :  { %1488 = vpow2.f32 %v1387_v14 }
0x14f5   :  { %v1487_v9 = vpop.eup %1486 }
0x14f6   :  { %989 = vrot.lane.b32.xlu1 %v1487_v9, %s1540_s12 }
0x14f7   :  { %v1489_v15 = vpop.eup %1488 }
0x14f8   :  { %v970_v16 = vadd.f32 1.0, %v1489_v15 }
0x14fa   :  { %1490 = vrcp.f32 %v970_v16  ;;  %v982_v5 = vand.u32 2147483648, %v970_v16  ;;  %vm976_vm13 = vweird.f32 %v970_v16  ;;  %v980_v19 = vand.u32 2147483647, %v970_v16 }
0x14fc   :  { %v983_v10 = vor.u32 1.1754944e-38, %v982_v5  ;;  %vm981_vm15 = vcmp.eq.f32.partialorder %v980_v19, 8.507059e+37 }
0x1500   :  { %v1491_v2 = vpop.eup %1490 }
0x1501   :  { %v972_v3 = vmul.f32 %v1491_v2, %v970_v16  ;;  %vm977_vm12 = vweird.f32 %v1491_v2 }
0x1502   :  { %vm978_vm14 = vmor %vm976_vm13, %vm977_vm12 }
0x1503   :  { %v973_v7 = vsub.f32 1.0, %v972_v3 }
0x1505   :  { %v974_v4 = vmul.f32 %v1491_v2, %v973_v7  ;;  %v1538_v7 = vld [vmem:[%s1945_s3] ss:$0 sm:$0xff] }
0x1507   :  { %v975_v18 = vadd.f32 %v1491_v2, %v974_v4  ;;  %v120_v4 = vadd.f32 %v1538_v7, %v1718_v13 }
0x1509   :  { %v979_v20 = vsel %vm978_vm14, %v1491_v2, %v975_v18  ;;  %v617_v5 = vadd.f32 %v1840_v0, %v120_v4 }
0x150a   :  { %v984_v8 = vsel %vm981_vm15, %v983_v10, %v979_v20 }
0x150b   :  { %v987_v22 = vmul.f32 %v984_v8, %v933_v57  ;;  %v737_v57 = vadd.f32 %v1813_v17, %v736_v56 }
0x1568   :  { %v990_v21 = vpop.permute.xlu1 %989 }
0x1569   :  { %v992_v12 = vmul.f32 %v990_v21, %v984_v8 }
0x156b   :  { %994 = vrot.lane.b32.xlu2 %v992_v12, %s1540_s12 }
0x15c5   :  { %v995_v23 = vpop.permute.xlu2 %994 }
0x15c6   :  { %v997_v24 = vadd.f32 %v995_v23, %v987_v22  ;;  %v1372_v23 = vmul.f32 -1.442695, %v617_v5 }
0x15c8   :  { %1492 = vtanh.f32 %v997_v24 }
0x15ce   :  { %v1493_v25 = vpop.eup %1492 }
0x15cf   :  { %1000 = vrot.lane.b32.xlu0 %v1493_v25, %s1540_s12 }
0x1641   :  { %v1001_v26 = vpop.permute.xlu0 %1000 }
0x1642   :  { %v1003_v27 = vmul.f32 %v1001_v26, %v984_v8 }
0x1644   :  { %1006 = vrot.lane.b32.xlu1 %v1003_v27, %s1541_s13 }
0x16b6   :  { %v1007_v28 = vpop.permute.xlu1 %1006 }
0x16b7   :  { %1388 = vmatmul.msk.f32.vlgmr.msrb.gmra.mxu1 %vm131_vm5, %v1007_v28 }
0x1734   :  { %v1027_v31 = vpop.f32.mrf.mxu1 }
0x1735   :  { %v1030_v32 = vadd.f32 %v1027_v31, %v734_v30 }
0x1737   :  { %1494 = vtanh.f32 %v1030_v32  ;;  %v1389_v34 = vmul.f32 -1.442695, %v1030_v32 }
0x1739   :  { %1496 = vpow2.f32 %v1389_v34 }
0x173d   :  { %v1495_v33 = vpop.eup %1494 }
0x173e   :  { %1053 = vrot.lane.b32.xlu2 %v1495_v33, %s1540_s12 }
0x173f   :  { %v1497_v35 = vpop.eup %1496 }
0x1740   :  { %v1034_v36 = vadd.f32 1.0, %v1497_v35 }
0x1742   :  { %1498 = vrcp.f32 %v1034_v36  ;;  %v1046_v42 = vand.u32 2147483648, %v1034_v36  ;;  %vm1040_vm1 = vweird.f32 %v1034_v36  ;;  %v1044_v43 = vand.u32 2147483647, %v1034_v36 }
0x1744   :  { %v1047_v45 = vor.u32 1.1754944e-38, %v1046_v42  ;;  %vm1045_vm3 = vcmp.eq.f32.partialorder %v1044_v43, 8.507059e+37 }
0x1748   :  { %v1499_v37 = vpop.eup %1498 }
0x1749   :  { %v1036_v38 = vmul.f32 %v1499_v37, %v1034_v36  ;;  %vm1041_vm0 = vweird.f32 %v1499_v37 }
0x174a   :  { %vm1042_vm2 = vmor %vm1040_vm1, %vm1041_vm0 }
0x174b   :  { %v1037_v39 = vsub.f32 1.0, %v1036_v38 }
0x174d   :  { %v1038_v40 = vmul.f32 %v1499_v37, %v1037_v39 }
0x174f   :  { %v1039_v41 = vadd.f32 %v1499_v37, %v1038_v40  ;;  %v739_v40 = vpop.f32.mrf.mxu3 }
0x1751   :  { %v1043_v44 = vsel %vm1042_vm2, %v1499_v37, %v1039_v41  ;;  %v740_v41 = vadd.f32 %v1813_v17, %v739_v40 }
0x1752   :  { %v1048_v47 = vsel %vm1045_vm3, %v1047_v45, %v1043_v44 }
0x1753   :  { %v1051_v49 = vmul.f32 %v1048_v47, %v997_v24 }
0x1798   :  { %v1054_v46 = vpop.permute.xlu2 %1053 }
0x1799   :  { %v1056_v48 = vmul.f32 %v1054_v46, %v1048_v47 }
0x179b   :  { %1058 = vrot.lane.b32.xlu0 %v1056_v48, %s1540_s12 }
0x180d   :  { %v1059_v50 = vpop.permute.xlu0 %1058 }
0x180e   :  { %v1061_v51 = vadd.f32 %v1059_v50, %v1051_v49 }
0x1810   :  { %1500 = vtanh.f32 %v1061_v51 }
0x1816   :  { %v1501_v53 = vpop.eup %1500 }
0x1817   :  { %1064 = vrot.lane.b32.xlu1 %v1501_v53, %s1540_s12 }
0x1889   :  { %v1065_v54 = vpop.permute.xlu1 %1064 }
0x188a   :  { %v1067_v11 = vmul.f32 %v1065_v54, %v1048_v47 }
0x188c   :  { %1070 = vrot.lane.b32.xlu2 %v1067_v11, %s1541_s13 }
0x18e6   :  { %v1071_v55 = vpop.permute.xlu2 %1070 }
0x18e7   :  { %1390 = vmatmul.msk.f32.vlgmr.msrb.gmra.mxu2 %vm131_vm5, %v1071_v55 }
0x196a   :  { %v1091_v58 = vpop.f32.mrf.mxu2 }
0x196b   :  { %v1094_v59 = vadd.f32 %v1091_v58, %v737_v57 }
0x196d   :  { %1502 = vtanh.f32 %v1094_v59  ;;  %v1391_v61 = vmul.f32 -1.442695, %v1094_v59 }
0x196f   :  { %1504 = vpow2.f32 %v1391_v61 }
0x1973   :  { %v1503_v60 = vpop.eup %1502 }
0x1974   :  { %1117 = vrot.lane.b32.xlu0 %v1503_v60, %s1540_s12 }
0x1975   :  { %v1505_v62 = vpop.eup %1504 }
0x1976   :  { %v1098_v63 = vadd.f32 1.0, %v1505_v62 }
0x1978   :  { %1506 = vrcp.f32 %v1098_v63  ;;  %v1110_v16 = vand.u32 2147483648, %v1098_v63  ;;  %vm1104_vm6 = vweird.f32 %v1098_v63  ;;  %v1108_v2 = vand.u32 2147483647, %v1098_v63 }
0x1979   :  { %1508 = vtanh.f32 %v617_v5 }
0x197a   :  { %v1111_v18 = vor.u32 1.1754944e-38, %v1110_v16  ;;  %vm1109_vm8 = vcmp.eq.f32.partialorder %v1108_v2, 8.507059e+37 }
0x197e   :  { %v1507_v1 = vpop.eup %1506 }
0x197f   :  { %v1100_v6 = vmul.f32 %v1507_v1, %v1098_v63  ;;  %vm1105_vm4 = vweird.f32 %v1507_v1  ;;  %v1509_v21 = vpop.eup %1508 }
0x1980   :  { %vm1106_vm7 = vmor %vm1104_vm6, %vm1105_vm4 }
0x1981   :  { %v1101_v9 = vsub.f32 1.0, %v1100_v6 }
0x1983   :  { %v1102_v14 = vmul.f32 %v1507_v1, %v1101_v9 }
0x1985   :  { %v1103_v15 = vadd.f32 %v1507_v1, %v1102_v14 }
0x1987   :  { %v1107_v3 = vsel %vm1106_vm7, %v1507_v1, %v1103_v15 }
0x1988   :  { %v1112_v20 = vsel %vm1109_vm8, %v1111_v18, %v1107_v3  ;;  %vm1344_vm8 = vcmask 31744  }
0x1989   :  { %v1115_v8 = vmul.f32 %v1112_v20, %v1061_v51 }
0x19e6   :  { %v1118_v19 = vpop.permute.xlu0 %1117 }
0x19e7   :  { %v1120_v10 = vmul.f32 %v1118_v19, %v1112_v20 }
0x19e9   :  { %1122 = vrot.lane.b32.xlu1 %v1120_v10, %s1540_s12 }
0x19f1   :  { %640 = vrot.lane.b32.xlu1 %v1509_v21, %s1540_s12 }
0x1a5b   :  { %v1123_v12 = vpop.permute.xlu1 %1122 }
0x1a5c   :  { %v1883_v22 = vadd.f32 %v1123_v12, %v1115_v8 }
0x1a5e   :  { %1510 = vtanh.f32 %v1883_v22 }
0x1a5f   :  { %1512 = vpow2.f32 %v1372_v23 }
0x1a63   :  { %v641_v36 = vpop.permute.xlu1 %640 }
0x1a64   :  { %v1511_v13 = vpop.eup %1510 }
0x1a65   :  { %1128 = vrot.lane.b32.xlu2 %v1511_v13, %s1540_s12  ;;  %v1513_v0 = vpop.eup %1512 }
0x1a66   :  { %v621_v24 = vadd.f32 1.0, %v1513_v0 }
0x1a68   :  { %1514 = vrcp.f32 %v621_v24  ;;  %v633_v32 = vand.u32 2147483648, %v621_v24  ;;  %vm627_vm10 = vweird.f32 %v621_v24  ;;  %v631_v33 = vand.u32 2147483647, %v621_v24 }
0x1a6a   :  { %v634_v35 = vor.u32 1.1754944e-38, %v633_v32  ;;  %vm632_vm12 = vcmp.eq.f32.partialorder %v631_v33, 8.507059e+37 }
0x1a6e   :  { %v1515_v25 = vpop.eup %1514 }
0x1a6f   :  { %v623_v26 = vmul.f32 %v1515_v25, %v621_v24  ;;  %vm628_vm9 = vweird.f32 %v1515_v25 }
0x1a70   :  { %vm629_vm11 = vmor %vm627_vm10, %vm628_vm9 }
0x1a71   :  { %v624_v27 = vsub.f32 1.0, %v623_v26 }
0x1a73   :  { %v625_v28 = vmul.f32 %v1515_v25, %v624_v27 }
0x1a75   :  { %v626_v30 = vadd.f32 %v1515_v25, %v625_v28 }
0x1a77   :  { %v630_v34 = vsel %vm629_vm11, %v1515_v25, %v626_v30 }
0x1a78   :  { %v635_v37 = vsel %vm632_vm12, %v634_v35, %v630_v34  ;;  %v1263_v35 = vld [vmem:[%s1949_s7 + $0x18] sm:$0xff] }
0x1a79   :  { %v643_v38 = vmul.f32 %v641_v36, %v635_v37  ;;  %v638_v45 = vmul.f32 %v635_v37, %v1821_v52  ;;  %v1262_v36 = vld [vmem:[%s1949_s7 + $0x10] sm:$0xff]  ;;  %1285 = vmatpush.msrb.mxu1 %v1263_v35 }
0x1a7b   :  { %1286 = vmatpush.msrb.mxu1 %v1262_v36 }
0x1abf   :  { %v1129_v29 = vpop.permute.xlu2 %1128 }
0x1ac0   :  { %v1131_v31 = vmul.f32 %v1129_v29, %v1112_v20 }
0x1ac2   :  { %1134 = vrot.lane.b32.xlu0 %v1131_v31, %s1541_s13 }
0x1aca   :  { %645 = vrot.lane.b32.xlu0 %v643_v38, %s1540_s12  ;;  %v1260_v38 = vld [vmem:[%s1949_s7] sm:$0xff] }
0x1b34   :  { %v1135_v39 = vpop.permute.xlu0 %1134 }
0x1b35   :  { %1392 = vmatmul.msk.f32.vlgmr.msra.gmra.mxu1 %vm131_vm5, %v1135_v39 }
0x1b3c   :  { %v646_v44 = vpop.permute.xlu0 %645 }
0x1b3d   :  { %v648_v46 = vadd.f32 %v646_v44, %v638_v45  ;;  %v1295_v44 = vld [vmem:[%s1951_s9 + $0x8] sm:$0xff]  ;;  %v1294_v45 = vld [vmem:[%s1951_s9] sm:$0xff] }
0x1bb2   :  { %v1155_v42 = vpop.f32.mrf.mxu1 }
0x1bb3   :  { %v1158_v43 = vadd.f32 %v1155_v42, %v740_v41  ;;  %v1297_v41 = vld [vmem:[%s1951_s9 + $0x18] sm:$0xff]  ;;  %v1296_v42 = vld [vmem:[%s1951_s9 + $0x10] sm:$0xff] }
0x1bb4   :  { %1317 = vmatpush.msrb.mxu2 %v1297_v41 }
0x1bb5   :  { %1516 = vtanh.f32 %v1158_v43  ;;  %v1393_v49 = vmul.f32 -1.442695, %v1158_v43 }
0x1bb6   :  { %1518 = vtanh.f32 %v648_v46  ;;  %1318 = vmatpush.msrb.mxu2 %v1296_v42  ;;  %v1404_v46 = vld [vmem:[%s1950_s8] ss:$0 sm:$0xff] }
0x1bb7   :  { %1520 = vpow2.f32 %v1393_v49 }
0x1bb8   :  { %1319 = vmatpush.msrb.mxu2 %v1295_v44 }
0x1bba   :  { %1320 = vmatpush.msrb.mxu2 %v1294_v45 }
0x1bbb   :  { %v1517_v47 = vpop.eup %1516 }
0x1bbc   :  { %1181 = vrot.lane.b32.xlu2 %v1517_v47, %s1540_s12  ;;  %v1519_v48 = vpop.eup %1518 }
0x1bbd   :  { %v1521_v50 = vpop.eup %1520 }
0x1bbe   :  { %v1162_v51 = vadd.f32 1.0, %v1521_v50  ;;  %v1405_v50 = vld [vmem:[%s1952_s10] ss:$0 sm:$0xff] }
0x1bc0   :  { %1522 = vrcp.f32 %v1162_v51  ;;  %v1174_v52 = vand.u32 2147483648, %v1162_v51  ;;  %vm1168_vm14 = vweird.f32 %v1162_v51  ;;  %v1172_v57 = vand.u32 2147483647, %v1162_v51 }
0x1bc2   :  { %v1175_v59 = vor.u32 1.1754944e-38, %v1174_v52  ;;  %vm1173_vm0 = vcmp.eq.f32.partialorder %v1172_v57, 8.507059e+37 }
0x1bc4   :  { %651 = vrot.lane.b32.xlu2 %v1519_v48, %s1540_s12 }
0x1bc6   :  { %v1523_v53 = vpop.eup %1522 }
0x1bc7   :  { %v1164_v54 = vmul.f32 %v1523_v53, %v1162_v51  ;;  %vm1169_vm13 = vweird.f32 %v1523_v53 }
0x1bc8   :  { %vm1170_vm15 = vmor %vm1168_vm14, %vm1169_vm13 }
0x1bc9   :  { %v1165_v11 = vsub.f32 1.0, %v1164_v54 }
0x1bcb   :  { %v1166_v55 = vmul.f32 %v1523_v53, %v1165_v11 }
0x1bcd   :  { %v1167_v56 = vadd.f32 %v1523_v53, %v1166_v55 }
0x1bcf   :  { %v1171_v58 = vsel %vm1170_vm15, %v1523_v53, %v1167_v56 }
0x1bd0   :  { %v1176_v61 = vsel %vm1173_vm0, %v1175_v59, %v1171_v58 }
0x1bd1   :  { %v1179_v6 = vmul.f32 %v1176_v61, %v1883_v22 }
0x1c16   :  { %v1182_v60 = vpop.permute.xlu2 %1181 }
0x1c17   :  { %v1184_v62 = vmul.f32 %v1182_v60, %v1176_v61 }
0x1c19   :  { %1186 = vrot.lane.b32.xlu1 %v1184_v62, %s1540_s12 }
0x1c1e   :  { %v652_v63 = vpop.permute.xlu2 %651 }
0x1c1f   :  { %v654_v1 = vmul.f32 %v652_v63, %v635_v37  ;;  %v1261_v37 = vld [vmem:[%s1949_s7 + $0x8] sm:$0xff] }
0x1c20   :  { %1287 = vmatpush.msrb.mxu1 %v1261_v37 }
0x1c21   :  { %656 = vrot.lane.b32.xlu1 %v654_v1, %s1541_s13 }
0x1c22   :  { %1288 = vmatpush.msrb.mxu1 %v1260_v38 }
0x1c8b   :  { %v1187_v9 = vpop.permute.xlu1 %1186 }
0x1c8c   :  { %v1189_v14 = vadd.f32 %v1187_v9, %v1179_v6 }
0x1c8e   :  { %1524 = vtanh.f32 %v1189_v14 }
0x1c93   :  { %v657_v15 = vpop.permute.xlu1 %656 }
0x1c94   :  { %v1525_v16 = vpop.eup %1524  ;;  %659 = vst.msk [vmem:[#allocation3 + $0x38] sm:$0xff] %vm131_vm5, %v657_v15 }
0x1c95   :  { %1192 = vrot.lane.b32.xlu0 %v1525_v16, %s1540_s12 }
0x1c9b   :  { %v676_v2 = vld [vmem:[#allocation3 + $0x38] sm:$0xff] }
0x1c9c   :  { %1380 = vmatmul.msk.f32.gmra.mxu3 %vm131_vm5, %v676_v2 }
0x1d07   :  { %v1193_v3 = vpop.permute.xlu0 %1192 }
0x1d08   :  { %v1195_v7 = vmul.f32 %v1193_v3, %v1176_v61 }
0x1d0a   :  { %1198 = vrot.lane.b32.xlu2 %v1195_v7, %s1541_s13 }
0x1d1f   :  { %v742_v18 = vpop.f32.mrf.mxu3 }
0x1d20   :  { %v743_v5 = vadd.f32 %v1813_v17, %v742_v18 }
0x1d64   :  { %v1199_v4 = vpop.permute.xlu2 %1198 }
0x1d65   :  { %1394 = vmatmul.msk.f32.vlgmr.msra.gmra.mxu2 %vm131_vm5, %v1199_v4 }
0x1de8   :  { %v1219_v19 = vpop.f32.mrf.mxu2 }
0x1de9   :  { %v1222_v20 = vadd.f32 %v1219_v19, %v743_v5 }
0x1deb   :  { %1526 = vtanh.f32 %v1222_v20  ;;  %v1395_v21 = vmul.f32 -1.442695, %v1222_v20 }
0x1ded   :  { %1528 = vpow2.f32 %v1395_v21 }
0x1df1   :  { %v1527_v10 = vpop.eup %1526 }
0x1df2   :  { %1245 = vrot.lane.b32.xlu0 %v1527_v10, %s1540_s12 }
0x1df3   :  { %v1529_v8 = vpop.eup %1528 }
0x1df4   :  { %v1226_v12 = vadd.f32 1.0, %v1529_v8 }
0x1df6   :  { %1530 = vrcp.f32 %v1226_v12  ;;  %v1238_v25 = vand.u32 2147483648, %v1226_v12  ;;  %vm1232_vm2 = vweird.f32 %v1226_v12  ;;  %v1236_v17 = vand.u32 2147483647, %v1226_v12 }
0x1df8   :  { %v1239_v27 = vor.u32 1.1754944e-38, %v1238_v25  ;;  %vm1237_vm4 = vcmp.eq.f32.partialorder %v1236_v17, 8.507059e+37 }
0x1dfc   :  { %v1531_v22 = vpop.eup %1530 }
0x1dfd   :  { %v1228_v13 = vmul.f32 %v1531_v22, %v1226_v12  ;;  %vm1233_vm1 = vweird.f32 %v1531_v22 }
0x1dfe   :  { %vm1234_vm3 = vmor %vm1232_vm2, %vm1233_vm1 }
0x1dff   :  { %v1229_v23 = vsub.f32 1.0, %v1228_v13 }
0x1e01   :  { %v1230_v0 = vmul.f32 %v1531_v22, %v1229_v23 }
0x1e03   :  { %v1231_v24 = vadd.f32 %v1531_v22, %v1230_v0 }
0x1e05   :  { %v1235_v26 = vsel %vm1234_vm3, %v1531_v22, %v1231_v24 }
0x1e06   :  { %v1240_v29 = vsel %vm1237_vm4, %v1239_v27, %v1235_v26 }
0x1e07   :  { %v1243_v31 = vmul.f32 %v1240_v29, %v1189_v14 }
0x1e64   :  { %v1246_v28 = vpop.permute.xlu0 %1245 }
0x1e65   :  { %v1248_v30 = vmul.f32 %v1246_v28, %v1240_v29 }
0x1e67   :  { %1250 = vrot.lane.b32.xlu1 %v1248_v30, %s1540_s12 }
0x1ed9   :  { %v1251_v32 = vpop.permute.xlu1 %1250 }
0x1eda   :  { %v1253_v33 = vadd.f32 %v1251_v32, %v1243_v31 }
0x1edc   :  { %1532 = vtanh.f32 %v1253_v33 }
0x1ee2   :  { %v1533_v34 = vpop.eup %1532 }
0x1ee3   :  { %1256 = vrot.lane.b32.xlu2 %v1533_v34, %s1540_s12 }
0x1f3d   :  { %v1257_v39 = vpop.permute.xlu2 %1256 }
0x1f3e   :  { %v1259_v40 = vmul.f32 %v1257_v39, %v1240_v29 }
0x1f40   :  { %1269 = vrot.lane.b32.xlu0 %v1259_v40, %s1541_s13 }
0x1fb2   :  { %v1270_v43 = vpop.permute.xlu0 %1269 }
0x1fb3   :  { %1396 = vmatmul.msk.f32.vlgmr.msrb.gmra.mxu1 %vm131_vm5, %v1270_v43 }
0x2030   :  { %v1290_v47 = vpop.f32.mrf.mxu1 }
0x2031   :  { %v1291_v48 = vadd.f32 %v1404_v46, %v1290_v47 }
0x2033   :  { %v1293_v49 = vmax.f32 %v1291_v48, 0.0 }
0x2035   :  { %1397 = vmatmul.msk.f32.vlgmr.msrb.gmra.mxu2 %vm131_vm5, %v1293_v49 }
0x20b8   :  { %v1322_v51 = vpop.f32.mrf.mxu2 }
0x20b9   :  { %v1323_v53 = vadd.f32 %v1405_v50, %v1322_v51 }
0x20bb   :  { %v1398_v54 = vmul.f32 -1.442695, %v1323_v53 }
0x20bd   :  { %1534 = vpow2.f32 %v1398_v54 }
0x20c3   :  { %v1535_v11 = vpop.eup %1534 }
0x20c4   :  { %v1328_v55 = vadd.f32 1.0, %v1535_v11 }
0x20c6   :  { %1536 = vrcp.f32 %v1328_v55  ;;  %v1340_v58 = vand.u32 2147483648, %v1328_v55  ;;  %v1338_v60 = vand.u32 2147483647, %v1328_v55  ;;  %vm1334_vm5 = vweird.f32 %v1328_v55 }
0x20c8   :  { %v1341_v62 = vor.u32 1.1754944e-38, %v1340_v58  ;;  %vm1339_vm9 = vcmp.eq.f32.partialorder %v1338_v60, 8.507059e+37 }
0x20cc   :  { %v1537_v56 = vpop.eup %1536 }
0x20cd   :  { %v1330_v52 = vmul.f32 %v1537_v56, %v1328_v55  ;;  %vm1335_vm6 = vweird.f32 %v1537_v56 }
0x20ce   :  { %vm1336_vm7 = vmor %vm1334_vm5, %vm1335_vm6 }
0x20cf   :  { %v1331_v57 = vsub.f32 1.0, %v1330_v52 }
0x20d1   :  { %v1332_v59 = vmul.f32 %v1537_v56, %v1331_v57 }
0x20d3   :  { %v1333_v61 = vadd.f32 %v1537_v56, %v1332_v59 }
0x20d5   :  { %v1337_v63 = vsel %vm1336_vm7, %v1537_v56, %v1333_v61 }
0x20d6   :  { %v1342_v1 = vsel %vm1339_vm9, %v1341_v62, %v1337_v63 }
0x20d7   :  { %1345 = vst.msk [vmem:[%s1953_s11] sm:$0xff] %vm1344_vm8, %v1342_v1 }

</bundles_post_ra>
